<compile_context>
chip_gen: v6e
topology: v6e:2x2x1
jax: 0.10.0
libtpu: 0.0.40
codegen_flags: <defaults>
</compile_context>

<pallas_src>
import functools

import jax
import jax.numpy as jnp
import numpy as np
from jax.experimental import pallas as pl
from jax.experimental.pallas import tpu as pltpu

LANE = 128
_EPS = 1e-12


def _round_up(v: int, m: int) -> int:
    return (v + m - 1) // m * m


# ----------------------------------------------------------------------------
# Fused Pallas kernel: 3 UHG graph-conv layers + MLP head, single invocation.
# ----------------------------------------------------------------------------
def _fused_uhg_dns_kernel(adj_hbm, x_ref, w0_ref, ws_ref, bs_ref,
                          out_ref, adj_vmem, adj_sem):
    # Start streaming the adjacency (largest input) into VMEM; it is only
    # needed after the first node-wise linear, so the DMA overlaps that matmul.
    adj_cp = pltpu.make_async_copy(adj_hbm, adj_vmem, adj_sem)
    adj_cp.start()

    b_all = bs_ref[...]                           # (8, Hp) f32 bias/head stack
    b0 = b_all[0:1, :]
    b1 = b_all[1:2, :]
    b2 = b_all[2:3, :]
    mb1 = b_all[3:4, :]
    mb2 = b_all[5:6, 0:1]                         # (1, 1) scalar bias

    # Layer-0 linear (MXU, bf16 in / f32 accumulate) while adj is in flight.
    xw = jnp.dot(x_ref[...], w0_ref[...],
                 preferred_element_type=jnp.float32) + b0      # (Np, Hp) f32

    adj_cp.wait()
    adj = adj_vmem[...]                           # (Np, Np) bf16, reused 3x

    def aggregate_norm(xw_f32):
        # neighborhood aggregation (MXU) + relu + projective L2 norm.
        # Norm reduction / rsqrt stay f32 (EUP rsqrt slot; v5e-safe).
        agg = jnp.dot(adj, xw_f32.astype(jnp.bfloat16),
                      preferred_element_type=jnp.float32)
        hf = jnp.maximum(agg, 0.0)
        inv = jax.lax.rsqrt(jnp.sum(hf * hf, axis=-1, keepdims=True) + _EPS)
        return hf * inv

    h = aggregate_norm(xw)                                     # layer 0
    for layer, b in ((0, b1), (1, b2)):                        # layers 1, 2
        xw = jnp.dot(h.astype(jnp.bfloat16), ws_ref[layer],
                     preferred_element_type=jnp.float32) + b
        h = aggregate_norm(xw)

    # MLP head: Linear(H,H) -> ReLU -> (Dropout=id) -> Linear(H,1) -> Sigmoid
    z = jnp.dot(h.astype(jnp.bfloat16), ws_ref[2],
                preferred_element_type=jnp.float32) + mb1
    z = jnp.maximum(z, 0.0)

    # Final (H,1) projection computed transposed (NT matmul against the whole
    # 8-row bias/head stack: one MXU pass, no M=1 edge case) so the kernel
    # emits a lane-dense (1, Np) row. Row 4 of the stack holds mlp_w2^T; the
    # other result rows are harmless byproducts that are never read.
    res = jax.lax.dot_general(
        b_all.astype(jnp.bfloat16), z.astype(jnp.bfloat16),
        dimension_numbers=(((1,), (1,)), ((), ())),
        preferred_element_type=jnp.float32)                    # (8, Np) f32
    out_ref[...] = jax.nn.sigmoid(res[4:5, :] + mb2)           # (1, Np)


def _full_spec(shape):
    # whole array as a single VMEM-resident block (no grid -> single step)
    return pl.BlockSpec(shape, lambda: tuple(0 for _ in shape))


def _pick_vmem_limit(required_bytes: int) -> int:
    # Generation-aware VMEM cap: v5e/v6e have 128 MiB physical, v7x 64 MiB.
    try:
        cap = int(pltpu.get_tpu_info().vmem_capacity_bytes)
    except Exception:  # conservative (v7x-sized) fallback
        cap = 64 * 1024 * 1024
    limit = min(max(2 * int(required_bytes), 16 * 1024 * 1024), int(cap * 0.8))
    return max(limit, 4 * 1024 * 1024)


def fused_uhg_dns(adj_p, x_p, w0, wstack, bstack):
    n_pad = adj_p.shape[0]
    f_pad = x_p.shape[1]
    h_pad = w0.shape[1]

    flops = 2 * n_pad * (f_pad * h_pad            # layer-0 linear
                         + 3 * n_pad * h_pad      # 3 aggregations
                         + 2 * h_pad * h_pad      # layer-1/2 linears
                         + h_pad * h_pad          # MLP linear
                         + 8 * h_pad)             # head projection
    bytes_accessed = (adj_p.size * 2 + x_p.size * 2 + w0.size * 2
                      + wstack.size * 2 + bstack.size * 4 + n_pad * 4)
    vmem_needed = (2 * adj_p.size                               # adj scratch
                   + 2 * (x_p.size + w0.size + wstack.size)
                   + 4 * bstack.size + 4 * n_pad
                   + 4 * 4 * n_pad * h_pad)                     # f32 temporaries

    return pl.pallas_call(
        _fused_uhg_dns_kernel,
        out_shape=jax.ShapeDtypeStruct((1, n_pad), jnp.float32),
        in_specs=[
            pl.BlockSpec(memory_space=pl.ANY),    # adjacency: manual async DMA
            _full_spec(x_p.shape),
            _full_spec(w0.shape),
            _full_spec(wstack.shape),
            _full_spec(bstack.shape),
        ],
        out_specs=_full_spec((1, n_pad)),
        scratch_shapes=[
            pltpu.VMEM(adj_p.shape, jnp.bfloat16),
            pltpu.SemaphoreType.DMA,
        ],
        compiler_params=pltpu.CompilerParams(
            vmem_limit_bytes=int(_pick_vmem_limit(vmem_needed))),
        cost_estimate=pl.CostEstimate(
            flops=int(flops),
            transcendentals=int(4 * n_pad),
            bytes_accessed=int(bytes_accessed)),
    )(adj_p, x_p, w0, wstack, bstack)


# ----------------------------------------------------------------------------
# Model glue (plain JAX): adjacency build + padding + parameter init + forward
# ----------------------------------------------------------------------------
def build_gcn_adjacency(edge_index, num_nodes):
    """Dense GCN-normalized adjacency with self loops: D^-1/2 (A+I) D^-1/2."""
    src, dst = edge_index[0], edge_index[1]
    a = jnp.zeros((num_nodes, num_nodes), jnp.float32)
    a = a.at[src, dst].set(1.0)
    a = a.at[dst, src].set(1.0)  # treat as undirected
    a = a + jnp.eye(num_nodes, dtype=jnp.float32)
    deg = jnp.sum(a, axis=-1)
    d_inv_sqrt = jax.lax.rsqrt(jnp.maximum(deg, 1e-12))
    return a * d_inv_sqrt[:, None] * d_inv_sqrt[None, :]


def _pad2(a, rows, cols):
    return jnp.pad(a, ((0, rows - a.shape[0]), (0, cols - a.shape[1])))


def init_params(key, input_dim, hidden_dim, num_layers=3):
    params = {"uhg_w": [], "uhg_b": []}
    dims = [input_dim] + [hidden_dim] * num_layers
    for i in range(num_layers):
        key, k = jax.random.split(key)
        scale = 1.0 / jnp.sqrt(jnp.float32(dims[i]))
        params["uhg_w"].append(
            jax.random.uniform(k, (dims[i], dims[i + 1]), jnp.float32, -scale, scale))
        params["uhg_b"].append(jnp.zeros((1, dims[i + 1]), jnp.float32))
    key, k1, k2 = jax.random.split(key, 3)
    s1 = 1.0 / jnp.sqrt(jnp.float32(hidden_dim))
    params["mlp_w1"] = jax.random.uniform(k1, (hidden_dim, hidden_dim), jnp.float32, -s1, s1)
    params["mlp_b1"] = jnp.zeros((1, hidden_dim), jnp.float32)
    params["mlp_w2"] = jax.random.uniform(k2, (hidden_dim, 1), jnp.float32, -s1, s1)
    params["mlp_b2"] = jnp.zeros((1, 1), jnp.float32)
    return params


@functools.partial(jax.jit, static_argnames=("num_nodes",))
def uhg_dns_forward(params, x, edge_index, num_nodes):
    input_dim = x.shape[1]
    hidden_dim = params["uhg_w"][0].shape[1]
    # Lane-dense padding: N, F, H all rounded up to 128.
    n_pad = _round_up(max(num_nodes, 1), LANE)
    f_pad = _round_up(input_dim, LANE)
    h_pad = _round_up(hidden_dim, LANE)

    adj = build_gcn_adjacency(edge_index, num_nodes)
    adj_p = _pad2(adj, n_pad, n_pad).astype(jnp.bfloat16)   # halve N^2 DMA bytes
    x_p = _pad2(x, n_pad, f_pad).astype(jnp.bfloat16)

    # zero-padded, pre-cast bf16 weights: padding keeps semantics exact
    # (extra rows/cols contribute 0).
    w0 = _pad2(params["uhg_w"][0], f_pad, h_pad).astype(jnp.bfloat16)
    wstack = jnp.stack([
        _pad2(params["uhg_w"][1], h_pad, h_pad),
        _pad2(params["uhg_w"][2], h_pad, h_pad),
        _pad2(params["mlp_w1"], h_pad, h_pad),
    ]).astype(jnp.bfloat16)                                  # (3, Hp, Hp) bf16

    # f32 bias/head stack (8, Hp): b0, b1, b2, mb1, mlp_w2^T row, mb2, 0, 0
    bstack = jnp.concatenate([
        _pad2(params["uhg_b"][0], 1, h_pad),
        _pad2(params["uhg_b"][1], 1, h_pad),
        _pad2(params["uhg_b"][2], 1, h_pad),
        _pad2(params["mlp_b1"], 1, h_pad),
        _pad2(params["mlp_w2"].T, 1, h_pad),
        _pad2(params["mlp_b2"], 1, h_pad),
        jnp.zeros((2, h_pad), jnp.float32),
    ], axis=0)                                               # (8, Hp) f32

    out = fused_uhg_dns(adj_p, x_p, w0, wstack, bstack)      # (1, n_pad)
    return out[0, :num_nodes].reshape(-1, 1)


def reference_forward(params, x, edge_index, num_nodes):
    """Pure-JAX f32 reference (same math as the kernel, no bf16)."""
    adj = build_gcn_adjacency(edge_index, num_nodes)
    h = x
    for w, b in zip(params["uhg_w"], params["uhg_b"]):
        agg = adj @ (h @ w + b)
        hf = jnp.maximum(agg, 0.0)
        h = hf * jax.lax.rsqrt(jnp.sum(hf * hf, axis=-1, keepdims=True) + _EPS)
    z = jnp.maximum(h @ params["mlp_w1"] + params["mlp_b1"], 0.0)
    logit = z @ params["mlp_w2"] + params["mlp_b2"]
    return jax.nn.sigmoid(logit)


# ----------------------------------------------------------------------------
if __name__ == "__main__":
    NUM_NODES = 8
    INPUT_DIM = 16
    HIDDEN_DIM = 64
    NUM_EDGES = 16

    root = jax.random.PRNGKey(0)
    k_x, k_src, k_dst, k_params = jax.random.split(root, 4)

    x = jax.random.normal(k_x, (NUM_NODES, INPUT_DIM), jnp.float32)
    edge_index = jnp.stack(
        [
            jax.random.randint(k_src, (NUM_EDGES,), 0, NUM_NODES),
            jax.random.randint(k_dst, (NUM_EDGES,), 0, NUM_NODES),
        ],
        axis=0,
    ).astype(jnp.int32)

    params = init_params(k_params, INPUT_DIM, HIDDEN_DIM, num_layers=3)

    out = uhg_dns_forward(params, x, edge_index, NUM_NODES)
    out = jax.block_until_ready(out)

    ref = reference_forward(params, x, edge_index, NUM_NODES)

    assert out.shape == (NUM_NODES, 1)
    assert bool(jnp.all(jnp.isfinite(out)))
    assert bool(jnp.all((out >= 0.0) & (out <= 1.0)))
    np.testing.assert_allclose(np.asarray(out), np.asarray(ref), atol=2e-2)
    print("KERNEL_OK")
</pallas_src>

<mosaic_0001>
module attributes {stable_mosaic.version = 11 : i64} {
  func.func @_fused_uhg_dns_kernel(%arg0: memref<128x128xbf16, #tpu.memory_space<any>>, %arg1: memref<128x128xbf16, #tpu.memory_space<vmem>>, %arg2: memref<128x128xbf16, #tpu.memory_space<vmem>>, %arg3: memref<3x128x128xbf16, #tpu.memory_space<vmem>>, %arg4: memref<8x128xf32, #tpu.memory_space<vmem>>, %arg5: memref<1x128xf32, #tpu.memory_space<vmem>>, %arg6: memref<128x128xbf16, #tpu.memory_space<vmem>>, %arg7: memref<!tpu.dma_semaphore, #tpu.memory_space<semaphore_mem>>) attributes {dimension_semantics = [], scalar_prefetch = 0 : i64, scratch_operands = 2 : i64, tpu.core_type = #tpu.core_type<tc>} {
    tpu.enqueue_dma source(%arg0 : memref<128x128xbf16, #tpu.memory_space<any>>) target(%arg6 : memref<128x128xbf16, #tpu.memory_space<vmem>>) target_semaphore(%arg7 : memref<!tpu.dma_semaphore, #tpu.memory_space<semaphore_mem>>)
    %c0 = arith.constant 0 : index
    %c0_0 = arith.constant 0 : index
    %0 = vector.load %arg4[%c0, %c0_0] : memref<8x128xf32, #tpu.memory_space<vmem>>, vector<8x128xf32>
    %1 = vector.extract_strided_slice %0 {offsets = [0, 0], sizes = [1, 128], strides = [1, 1]} : vector<8x128xf32> to vector<1x128xf32>
    %2 = vector.extract_strided_slice %0 {offsets = [1, 0], sizes = [1, 128], strides = [1, 1]} : vector<8x128xf32> to vector<1x128xf32>
    %3 = vector.extract_strided_slice %0 {offsets = [2, 0], sizes = [1, 128], strides = [1, 1]} : vector<8x128xf32> to vector<1x128xf32>
    %4 = vector.extract_strided_slice %0 {offsets = [3, 0], sizes = [1, 128], strides = [1, 1]} : vector<8x128xf32> to vector<1x128xf32>
    %5 = vector.extract_strided_slice %0 {offsets = [5, 0], sizes = [1, 1], strides = [1, 1]} : vector<8x128xf32> to vector<1x1xf32>
    %c0_1 = arith.constant 0 : index
    %c0_2 = arith.constant 0 : index
    %6 = vector.load %arg1[%c0_1, %c0_2] : memref<128x128xbf16, #tpu.memory_space<vmem>>, vector<128x128xbf16>
    %c0_3 = arith.constant 0 : index
    %c0_4 = arith.constant 0 : index
    %7 = vector.load %arg2[%c0_3, %c0_4] : memref<128x128xbf16, #tpu.memory_space<vmem>>, vector<128x128xbf16>
    %cst = arith.constant dense<0.000000e+00> : vector<128x128xf32>
    %8 = tpu.matmul %6, %7, %cst {dimension_numbers = #tpu.dot_dimension_numbers<[1], [0], [0], [1], [0, 0, 1, 1], [], []>} : vector<128x128xbf16>, vector<128x128xbf16>, vector<128x128xf32> -> vector<128x128xf32>
    %9 = vector.broadcast %1 : vector<1x128xf32> to vector<128x128xf32>
    %10 = arith.addf %8, %9 : vector<128x128xf32>
    tpu.wait_dma2 semaphore(%arg7 : memref<!tpu.dma_semaphore, #tpu.memory_space<semaphore_mem>>) src(%arg0 : memref<128x128xbf16, #tpu.memory_space<any>>) dst(%arg6 : memref<128x128xbf16, #tpu.memory_space<vmem>>)
    %c0_5 = arith.constant 0 : index
    %c0_6 = arith.constant 0 : index
    %11 = vector.load %arg6[%c0_5, %c0_6] : memref<128x128xbf16, #tpu.memory_space<vmem>>, vector<128x128xbf16>
    %12 = arith.truncf %10 : vector<128x128xf32> to vector<128x128xbf16>
    %cst_7 = arith.constant dense<0.000000e+00> : vector<128x128xf32>
    %13 = tpu.matmul %11, %12, %cst_7 {dimension_numbers = #tpu.dot_dimension_numbers<[1], [0], [0], [1], [0, 0, 1, 1], [], []>} : vector<128x128xbf16>, vector<128x128xbf16>, vector<128x128xf32> -> vector<128x128xf32>
    %cst_8 = arith.constant 0.000000e+00 : f32
    %14 = vector.broadcast %cst_8 : f32 to vector<128x128xf32>
    %15 = arith.maximumf %13, %14 : vector<128x128xf32>
    %16 = arith.mulf %15, %15 : vector<128x128xf32>
    %cst_9 = arith.constant dense<0.000000e+00> : vector<128xf32>
    %17 = vector.multi_reduction <add>, %16, %cst_9 [1] : vector<128x128xf32> to vector<128xf32>
    %18 = vector.shape_cast %17 : vector<128xf32> to vector<128x1xf32>
    %cst_10 = arith.constant 9.99999996E-13 : f32
    %19 = vector.broadcast %cst_10 : f32 to vector<128x1xf32>
    %20 = arith.addf %18, %19 : vector<128x1xf32>
    %21 = math.rsqrt %20 : vector<128x1xf32>
    %22 = vector.broadcast %21 : vector<128x1xf32> to vector<128x128xf32>
    %23 = arith.mulf %15, %22 : vector<128x128xf32>
    %24 = arith.truncf %23 : vector<128x128xf32> to vector<128x128xbf16>
    %c0_11 = arith.constant 0 : index
    %c0_12 = arith.constant 0 : index
    %c0_13 = arith.constant 0 : index
    %25 = vector.load %arg3[%c0_11, %c0_12, %c0_13] : memref<3x128x128xbf16, #tpu.memory_space<vmem>>, vector<1x128x128xbf16>
    %26 = vector.shape_cast %25 : vector<1x128x128xbf16> to vector<128x128xbf16>
    %cst_14 = arith.constant dense<0.000000e+00> : vector<128x128xf32>
    %27 = tpu.matmul %24, %26, %cst_14 {dimension_numbers = #tpu.dot_dimension_numbers<[1], [0], [0], [1], [0, 0, 1, 1], [], []>} : vector<128x128xbf16>, vector<128x128xbf16>, vector<128x128xf32> -> vector<128x128xf32>
    %28 = vector.broadcast %2 : vector<1x128xf32> to vector<128x128xf32>
    %29 = arith.addf %27, %28 : vector<128x128xf32>
    %30 = arith.truncf %29 : vector<128x128xf32> to vector<128x128xbf16>
    %cst_15 = arith.constant dense<0.000000e+00> : vector<128x128xf32>
    %31 = tpu.matmul %11, %30, %cst_15 {dimension_numbers = #tpu.dot_dimension_numbers<[1], [0], [0], [1], [0, 0, 1, 1], [], []>} : vector<128x128xbf16>, vector<128x128xbf16>, vector<128x128xf32> -> vector<128x128xf32>
    %cst_16 = arith.constant 0.000000e+00 : f32
    %32 = vector.broadcast %cst_16 : f32 to vector<128x128xf32>
    %33 = arith.maximumf %31, %32 : vector<128x128xf32>
    %34 = arith.mulf %33, %33 : vector<128x128xf32>
    %cst_17 = arith.constant dense<0.000000e+00> : vector<128xf32>
    %35 = vector.multi_reduction <add>, %34, %cst_17 [1] : vector<128x128xf32> to vector<128xf32>
    %36 = vector.shape_cast %35 : vector<128xf32> to vector<128x1xf32>
    %cst_18 = arith.constant 9.99999996E-13 : f32
    %37 = vector.broadcast %cst_18 : f32 to vector<128x1xf32>
    %38 = arith.addf %36, %37 : vector<128x1xf32>
    %39 = math.rsqrt %38 : vector<128x1xf32>
    %40 = vector.broadcast %39 : vector<128x1xf32> to vector<128x128xf32>
    %41 = arith.mulf %33, %40 : vector<128x128xf32>
    %42 = arith.truncf %41 : vector<128x128xf32> to vector<128x128xbf16>
    %c1 = arith.constant 1 : index
    %c0_19 = arith.constant 0 : index
    %c0_20 = arith.constant 0 : index
    %43 = vector.load %arg3[%c1, %c0_19, %c0_20] : memref<3x128x128xbf16, #tpu.memory_space<vmem>>, vector<1x128x128xbf16>
    %44 = vector.shape_cast %43 : vector<1x128x128xbf16> to vector<128x128xbf16>
    %cst_21 = arith.constant dense<0.000000e+00> : vector<128x128xf32>
    %45 = tpu.matmul %42, %44, %cst_21 {dimension_numbers = #tpu.dot_dimension_numbers<[1], [0], [0], [1], [0, 0, 1, 1], [], []>} : vector<128x128xbf16>, vector<128x128xbf16>, vector<128x128xf32> -> vector<128x128xf32>
    %46 = vector.broadcast %3 : vector<1x128xf32> to vector<128x128xf32>
    %47 = arith.addf %45, %46 : vector<128x128xf32>
    %48 = arith.truncf %47 : vector<128x128xf32> to vector<128x128xbf16>
    %cst_22 = arith.constant dense<0.000000e+00> : vector<128x128xf32>
    %49 = tpu.matmul %11, %48, %cst_22 {dimension_numbers = #tpu.dot_dimension_numbers<[1], [0], [0], [1], [0, 0, 1, 1], [], []>} : vector<128x128xbf16>, vector<128x128xbf16>, vector<128x128xf32> -> vector<128x128xf32>
    %cst_23 = arith.constant 0.000000e+00 : f32
    %50 = vector.broadcast %cst_23 : f32 to vector<128x128xf32>
    %51 = arith.maximumf %49, %50 : vector<128x128xf32>
    %52 = arith.mulf %51, %51 : vector<128x128xf32>
    %cst_24 = arith.constant dense<0.000000e+00> : vector<128xf32>
    %53 = vector.multi_reduction <add>, %52, %cst_24 [1] : vector<128x128xf32> to vector<128xf32>
    %54 = vector.shape_cast %53 : vector<128xf32> to vector<128x1xf32>
    %cst_25 = arith.constant 9.99999996E-13 : f32
    %55 = vector.broadcast %cst_25 : f32 to vector<128x1xf32>
    %56 = arith.addf %54, %55 : vector<128x1xf32>
    %57 = math.rsqrt %56 : vector<128x1xf32>
    %58 = vector.broadcast %57 : vector<128x1xf32> to vector<128x128xf32>
    %59 = arith.mulf %51, %58 : vector<128x128xf32>
    %60 = arith.truncf %59 : vector<128x128xf32> to vector<128x128xbf16>
    %c2 = arith.constant 2 : index
    %c0_26 = arith.constant 0 : index
    %c0_27 = arith.constant 0 : index
    %61 = vector.load %arg3[%c2, %c0_26, %c0_27] : memref<3x128x128xbf16, #tpu.memory_space<vmem>>, vector<1x128x128xbf16>
    %62 = vector.shape_cast %61 : vector<1x128x128xbf16> to vector<128x128xbf16>
    %cst_28 = arith.constant dense<0.000000e+00> : vector<128x128xf32>
    %63 = tpu.matmul %60, %62, %cst_28 {dimension_numbers = #tpu.dot_dimension_numbers<[1], [0], [0], [1], [0, 0, 1, 1], [], []>} : vector<128x128xbf16>, vector<128x128xbf16>, vector<128x128xf32> -> vector<128x128xf32>
    %64 = vector.broadcast %4 : vector<1x128xf32> to vector<128x128xf32>
    %65 = arith.addf %63, %64 : vector<128x128xf32>
    %cst_29 = arith.constant 0.000000e+00 : f32
    %66 = vector.broadcast %cst_29 : f32 to vector<128x128xf32>
    %67 = arith.maximumf %65, %66 : vector<128x128xf32>
    %68 = arith.truncf %0 : vector<8x128xf32> to vector<8x128xbf16>
    %69 = arith.truncf %67 : vector<128x128xf32> to vector<128x128xbf16>
    %cst_30 = arith.constant dense<0.000000e+00> : vector<8x128xf32>
    %70 = tpu.matmul %68, %69, %cst_30 {dimension_numbers = #tpu.dot_dimension_numbers<[1], [1], [0], [0], [0, 0, 1, 0], [], []>} : vector<8x128xbf16>, vector<128x128xbf16>, vector<8x128xf32> -> vector<8x128xf32>
    %71 = vector.extract_strided_slice %70 {offsets = [4, 0], sizes = [1, 128], strides = [1, 1]} : vector<8x128xf32> to vector<1x128xf32>
    %72 = vector.broadcast %5 : vector<1x1xf32> to vector<1x128xf32>
    %73 = arith.addf %71, %72 : vector<1x128xf32>
    %74 = arith.negf %73 : vector<1x128xf32>
    %75 = math.exp %74 : vector<1x128xf32>
    %cst_31 = arith.constant 1.000000e+00 : f32
    %76 = vector.broadcast %cst_31 : f32 to vector<1x128xf32>
    %77 = arith.addf %76, %75 : vector<1x128xf32>
    %78 = arith.divf %76, %77 : vector<1x128xf32>
    %c0_32 = arith.constant 0 : index
    %c0_33 = arith.constant 0 : index
    %79 = vector.load %arg5[%c0_32, %c0_33] : memref<1x128xf32, #tpu.memory_space<vmem>>, vector<1x128xf32>
    tpu.vector_store %arg5[%c0_32, %c0_33], %78 {strides = array<i32>} : memref<1x128xf32, #tpu.memory_space<vmem>>, vector<1x128xf32>,
    return
  }
}

</mosaic_0001>

<bundles_post_ra>
// kernel: uhg_dns_forward.1
= control target key start
LH: loop header
LB: loop body
LE: loop exit
PB: predicated region body
PF: predicated region fallthrough
CT: control target
= control target key end

     0   :  { %s2731_s0 = inlined_call_operand.vmem [shape: bf16[128,128], index: 0, kind: input, shape index: {}]   ;;  %s2732_s1 = inlined_call_operand.vmem [shape: bf16[128,128], index: 1, kind: input, shape index: {}]   ;;  %s2733_s2 = inlined_call_operand.vmem [shape: bf16[128,128], index: 2, kind: input, shape index: {}]   ;;  %s2734_s3 = inlined_call_operand.vmem [shape: bf16[3,128,128], index: 3, kind: input, shape index: {}]   ;;  %s2735_s4 = inlined_call_operand.vmem [shape: f32[8,128], index: 4, kind: input, shape index: {}]   ;;  %s2736_s5 = inlined_call_operand.vmem [shape: f32[1,128], index: 5, kind: output, shape index: {}]  }
   0x1   :  { %v52_v0 = vld [vmem:[%s2731_s0] sm:$0xff]  ;;  %v54_v1 = vld [vmem:[%s2731_s0 + $0x8] sm:$0xff]  ;;  %v56_v2 = vld [vmem:[%s2731_s0 + $0x10] sm:$0xff] }
   0x2   :  { %53 = vst [vmem:[#allocation2] sm:$0xff] %v52_v0  ;;  %55 = vst [vmem:[#allocation2 + $0x8] sm:$0xff] %v54_v1  ;;  %v58_v3 = vld [vmem:[%s2731_s0 + $0x18] sm:$0xff]  ;;  %v60_v4 = vld [vmem:[%s2731_s0 + $0x20] sm:$0xff] }
   0x3   :  { %57 = vst [vmem:[#allocation2 + $0x10] sm:$0xff] %v56_v2  ;;  %v62_v5 = vld [vmem:[%s2731_s0 + $0x28] sm:$0xff]  ;;  %59 = vst [vmem:[#allocation2 + $0x18] sm:$0xff] %v58_v3  ;;  %v64_v6 = vld [vmem:[%s2731_s0 + $0x30] sm:$0xff] }
   0x4   :  { %61 = vst [vmem:[#allocation2 + $0x20] sm:$0xff] %v60_v4  ;;  %63 = vst [vmem:[#allocation2 + $0x28] sm:$0xff] %v62_v5  ;;  %v66_v7 = vld [vmem:[%s2731_s0 + $0x38] sm:$0xff] }
   0x5   :  { %65 = vst [vmem:[#allocation2 + $0x30] sm:$0xff] %v64_v6  ;;  %67 = vst [vmem:[#allocation2 + $0x38] sm:$0xff] %v66_v7 }
   0x6   :  { %75 = vsyncadd [#allocation3], 1024  ;;  %v2093_v8 = vld [vmem:[%s2733_s2 + $0x38] sm:$0xff]   ;;  %v2094_v9 = vld [vmem:[%s2733_s2 + $0x30] sm:$0xff]   ;;  %v109_v24 = vlaneseq }
   0x7   :  { %1846 = vmatprep.subr.bf16.mxu0 %v2093_v8  ;;  %v2095_v10 = vld [vmem:[%s2733_s2 + $0x28] sm:$0xff]   ;;  %v2096_v11 = vld [vmem:[%s2733_s2 + $0x20] sm:$0xff]   ;;  %v2097_v13 = vld [vmem:[%s2733_s2 + $0x18] sm:$0xff]  }
   0x8   :  { %1847 = vmatpush3.bf16.msra.mxu0 %v2093_v8  ;;  %v2101_v12 = vld [vmem:[%s2732_s1] sm:$0xff]   ;;  %v2098_v14 = vld [vmem:[%s2733_s2 + $0x10] sm:$0xff]   ;;  %v2099_v15 = vld [vmem:[%s2733_s2 + $0x8] sm:$0xff]   ;;  %v2350_v25 = vshrl.u32 %v109_v24, 7 }
   0x9   :  { %1848 = vmatprep.subr.bf16.mxu0 %v2094_v9  ;;  %1862 = vmatprep.mubr.bf16.mxu0 %v2101_v12  ;;  %v2100_v16 = vld [vmem:[%s2733_s2] sm:$0xff]   ;;  %v2102_v17 = vld [vmem:[%s2732_s1 + $0x8] sm:$0xff]   ;;  %v2103_v18 = vld [vmem:[%s2732_s1 + $0x10] sm:$0xff]  }
   0xa   :  { %v2104_v19 = vld [vmem:[%s2732_s1 + $0x18] sm:$0xff]   ;;  %v2105_v20 = vld [vmem:[%s2732_s1 + $0x20] sm:$0xff]   ;;  %v2106_v21 = vld [vmem:[%s2732_s1 + $0x28] sm:$0xff]   ;;  %v111_v26 = vsub.s32 0, %v2350_v25 }
   0xb   :  { %v2107_v22 = vld [vmem:[%s2732_s1 + $0x30] sm:$0xff]   ;;  %v2108_v23 = vld [vmem:[%s2732_s1 + $0x38] sm:$0xff]   ;;  %v2356_v27 = vld [vmem:[%s2735_s4] sm:$0xff] }
   0xc   :  { %1849 = vmatpush3.bf16.msra.mxu0 %v2094_v9  ;;  %v112_v28 = vrot.slane %v2356_v27, %v111_v26 }
   0xd   :  { %1850 = vmatprep.subr.bf16.mxu0 %v2095_v10 }
  0x10   :  { %1851 = vmatpush3.bf16.msra.mxu0 %v2095_v10 }
  0x11   :  { %1852 = vmatprep.subr.bf16.mxu0 %v2096_v11 }
  0x14   :  { %1853 = vmatpush3.bf16.msra.mxu0 %v2096_v11 }
  0x15   :  { %1854 = vmatprep.subr.bf16.mxu0 %v2097_v13 }
  0x18   :  { %1855 = vmatpush3.bf16.msra.mxu0 %v2097_v13 }
  0x19   :  { %1856 = vmatprep.subr.bf16.mxu0 %v2098_v14 }
  0x1c   :  { %1857 = vmatpush3.bf16.msra.mxu0 %v2098_v14 }
  0x1d   :  { %1858 = vmatprep.subr.bf16.mxu0 %v2099_v15 }
  0x20   :  { %1859 = vmatpush3.bf16.msra.mxu0 %v2099_v15 }
  0x21   :  { %1860 = vmatprep.subr.bf16.mxu0 %v2100_v16 }
  0x24   :  { %1861 = vmatpush3.bf16.msra.mxu0 %v2100_v16 }
  0x27   :  { %1863 = vmatmul.mubr.bf16.vlgmr.msra.gmra.mxu0 %v2102_v17 }
  0x28   :  { %1866 = vmatprep.mubr.bf16.mxu0 %v2103_v18 }
  0x2f   :  { %1867 = vmatmul.mubr.bf16.gmra.mxu0 %v2104_v19 }
  0x30   :  { %1870 = vmatprep.mubr.bf16.mxu0 %v2105_v20 }
  0x37   :  { %1871 = vmatmul.mubr.bf16.gmra.mxu0 %v2106_v21 }
  0x38   :  { %1874 = vmatprep.mubr.bf16.mxu0 %v2107_v22 }
  0x3f   :  { %1875 = vmatmul.mubr.bf16.gmra.mxu0 %v2108_v23 }
  0xe7   :  { %v1864_v29 = vpop.f32.mrf.mxu0 }
  0xe8   :  { %v252_v30 = vadd.f32 %v1864_v29, %v112_v28 }
  0xe9   :  { %v243_v31 = vpop.f32.mrf.mxu0 }
  0xea   :  { %v244_v32 = vadd.f32 %v243_v31, %v112_v28 }
  0xeb   :  { %v1865_v33 = vpop.f32.mrf.mxu0 }
  0xec   :  { %v255_v34 = vadd.f32 %v1865_v33, %v112_v28 }
  0xed   :  { %v246_v35 = vpop.f32.mrf.mxu0 }
  0xee   :  { %v247_v36 = vadd.f32 %v246_v35, %v112_v28 }
  0xef   :  { %v1868_v37 = vpop.f32.mrf.mxu0 }
  0xf0   :  { %v268_v38 = vadd.f32 %v1868_v37, %v112_v28 }
  0xf1   :  { %v259_v39 = vpop.f32.mrf.mxu0 }
  0xf2   :  { %v260_v40 = vadd.f32 %v259_v39, %v112_v28 }
  0xf3   :  { %v1869_v41 = vpop.f32.mrf.mxu0 }
  0xf4   :  { %v271_v42 = vadd.f32 %v1869_v41, %v112_v28 }
  0xf5   :  { %v262_v43 = vpop.f32.mrf.mxu0 }
  0xf6   :  { %v263_v44 = vadd.f32 %v262_v43, %v112_v28 }
  0xf7   :  { %v1872_v45 = vpop.f32.mrf.mxu0 }
  0xf8   :  { %v284_v46 = vadd.f32 %v1872_v45, %v112_v28 }
  0xf9   :  { %v275_v47 = vpop.f32.mrf.mxu0 }
  0xfa   :  { %v276_v48 = vadd.f32 %v275_v47, %v112_v28 }
  0xfb   :  { %v1873_v49 = vpop.f32.mrf.mxu0 }
  0xfc   :  { %v287_v50 = vadd.f32 %v1873_v49, %v112_v28 }
  0xfd   :  { %v278_v51 = vpop.f32.mrf.mxu0 }
  0xfe   :  { %v279_v52 = vadd.f32 %v278_v51, %v112_v28 }
  0xff   :  { %v1876_v53 = vpop.f32.mrf.mxu0 }
 0x100   :  { %v300_v54 = vadd.f32 %v1876_v53, %v112_v28 }
 0x101   :  { %v291_v55 = vpop.f32.mrf.mxu0 }
 0x102   :  { %v292_v56 = vadd.f32 %v291_v55, %v112_v28 }
 0x103   :  { %v1877_v57 = vpop.f32.mrf.mxu0 }
 0x104   :  { %v303_v58 = vadd.f32 %v1877_v57, %v112_v28 }
 0x105   :  { %v294_v59 = vpop.f32.mrf.mxu0 }
 0x106   :  { %v295_v60 = vadd.f32 %v294_v59, %v112_v28  ;;  %v333_v61 = vpack.c.bf16 %v303_v58, %v300_v54 }
 0x108   :  { %v332_v62 = vpack.c.bf16 %v295_v60, %v292_v56 }
 0x109   :  { %2243 = dma.done.wait [#allocation3], 1024 }
 0x10a   :  { %2244 = vsyncadd [#allocation3], 4294966272  ;;  %1878 = vmatprep.subr.bf16.mxu1 %v333_v61  ;;  %v331_v63 = vpack.c.bf16 %v287_v50, %v284_v46  ;;  %v2359_v0 = vld [vmem:[#allocation2] sm:$0xff]   ;;  %v330_v1 = vpack.c.bf16 %v279_v52, %v276_v48  ;;  %v329_v2 = vpack.c.bf16 %v271_v42, %v268_v38  ;;  %v328_v3 = vpack.c.bf16 %v263_v44, %v260_v40  ;;  %v2362_v6 = vld [vmem:[#allocation2 + $0x8] sm:$0xff]  }
 0x10b   :  { %1879 = vmatpush3.bf16.msra.mxu1 %v333_v61  ;;  %1894 = vmatprep.mubr.bf16.mxu1 %v2359_v0  ;;  %v327_v4 = vpack.c.bf16 %v255_v34, %v252_v30  ;;  %v326_v5 = vpack.c.bf16 %v247_v36, %v244_v32  ;;  %v2364_v7 = vld [vmem:[#allocation2 + $0x10] sm:$0xff]   ;;  %v2368_v8 = vld [vmem:[#allocation2 + $0x18] sm:$0xff]   ;;  %v2370_v9 = vld [vmem:[#allocation2 + $0x20] sm:$0xff]   ;;  %vm2246_vm0 = vmmov 0  }
 0x10c   :  { %1880 = vmatprep.subr.bf16.mxu1 %v332_v62  ;;  %v2374_v10 = vld [vmem:[#allocation2 + $0x28] sm:$0xff]   ;;  %v2376_v11 = vld [vmem:[#allocation2 + $0x30] sm:$0xff]   ;;  %v2380_v12 = vld [vmem:[#allocation2 + $0x38] sm:$0xff]  }
 0x10d   :  { %v2118_v13 = vld [vmem:[%s2734_s3 + $0x38] sm:$0xff]   ;;  %v2119_v14 = vld [vmem:[%s2734_s3 + $0x30] sm:$0xff]   ;;  %v2120_v38 = vld [vmem:[%s2734_s3 + $0x28] sm:$0xff]  }
 0x10e   :  { %1910 = vmatprep.subr.bf16.mxu0 %v2118_v13  ;;  %v2121_v45 = vld [vmem:[%s2734_s3 + $0x20] sm:$0xff]   ;;  %v2122_v52 = vld [vmem:[%s2734_s3 + $0x18] sm:$0xff]  }
 0x10f   :  { %1881 = vmatpush3.bf16.msra.mxu1 %v332_v62  ;;  %1911 = vmatpush3.bf16.msra.mxu0 %v2118_v13  ;;  %v2123_v62 = vld [vmem:[%s2734_s3 + $0x10] sm:$0xff]  }
 0x110   :  { %1882 = vmatprep.subr.bf16.mxu1 %v331_v63  ;;  %1912 = vmatprep.subr.bf16.mxu0 %v2119_v14 }
 0x113   :  { %1883 = vmatpush3.bf16.msra.mxu1 %v331_v63  ;;  %1913 = vmatpush3.bf16.msra.mxu0 %v2119_v14  ;;  %v2125_v14 = vld [vmem:[%s2734_s3] sm:$0xff]  }
 0x114   :  { %1884 = vmatprep.subr.bf16.mxu1 %v330_v1  ;;  %1914 = vmatprep.subr.bf16.mxu0 %v2120_v38 }
 0x117   :  { %1885 = vmatpush3.bf16.msra.mxu1 %v330_v1  ;;  %1915 = vmatpush3.bf16.msra.mxu0 %v2120_v38 }
 0x118   :  { %1886 = vmatprep.subr.bf16.mxu1 %v329_v2  ;;  %1916 = vmatprep.subr.bf16.mxu0 %v2121_v45 }
 0x11b   :  { %1887 = vmatpush3.bf16.msra.mxu1 %v329_v2  ;;  %1917 = vmatpush3.bf16.msra.mxu0 %v2121_v45 }
 0x11c   :  { %1888 = vmatprep.subr.bf16.mxu1 %v328_v3  ;;  %1918 = vmatprep.subr.bf16.mxu0 %v2122_v52 }
 0x11f   :  { %1889 = vmatpush3.bf16.msra.mxu1 %v328_v3  ;;  %1919 = vmatpush3.bf16.msra.mxu0 %v2122_v52 }
 0x120   :  { %1890 = vmatprep.subr.bf16.mxu1 %v327_v4  ;;  %1920 = vmatprep.subr.bf16.mxu0 %v2123_v62 }
 0x123   :  { %1891 = vmatpush3.bf16.msra.mxu1 %v327_v4  ;;  %1921 = vmatpush3.bf16.msra.mxu0 %v2123_v62 }
 0x124   :  { %1892 = vmatprep.subr.bf16.mxu1 %v326_v5 }
 0x127   :  { %1893 = vmatpush3.bf16.msra.mxu1 %v326_v5  ;;  %v2124_v5 = vld [vmem:[%s2734_s3 + $0x8] sm:$0xff]  }
 0x128   :  { %1922 = vmatprep.subr.bf16.mxu0 %v2124_v5 }
 0x129   :  { %1923 = vmatpush3.bf16.msra.mxu0 %v2124_v5 }
 0x12a   :  { %1895 = vmatmul.mubr.bf16.vlgmr.msra.gmra.mxu1 %v2362_v6  ;;  %1924 = vmatprep.subr.bf16.mxu0 %v2125_v14 }
 0x12b   :  { %1898 = vmatprep.mubr.bf16.mxu1 %v2364_v7 }
 0x12d   :  { %1925 = vmatpush3.bf16.msra.mxu0 %v2125_v14 }
 0x132   :  { %1899 = vmatmul.mubr.bf16.gmra.mxu1 %v2368_v8 }
 0x133   :  { %1902 = vmatprep.mubr.bf16.mxu1 %v2370_v9 }
 0x13a   :  { %1903 = vmatmul.mubr.bf16.gmra.mxu1 %v2374_v10 }
 0x13b   :  { %1906 = vmatprep.mubr.bf16.mxu1 %v2376_v11 }
 0x142   :  { %1907 = vmatmul.mubr.bf16.gmra.mxu1 %v2380_v12 }
 0x143   :  { %1958 = vmatprep.mubr.bf16.mxu1 %v2359_v0 }
 0x1ea   :  { %v1896_v15 = vpop.f32.mrf.mxu1 }
 0x1eb   :  { %v2390_v16 = vmax.f32 %v1896_v15, 0.0 }
 0x1ec   :  { %v416_v17 = vpop.f32.mrf.mxu1 }
 0x1ed   :  { %v2392_v18 = vmax.f32 %v416_v17, 0.0  ;;  %v497_v19 = vmul.f32 %v2390_v16, %v2390_v16 }
 0x1ee   :  { %v1897_v20 = vpop.f32.mrf.mxu1 }
 0x1ef   :  { %v2396_v21 = vmax.f32 %v1897_v20, 0.0  ;;  %515 = vadd.xlane.f32.xlu1 %v497_v19  ;;  %v495_v22 = vmul.f32 %v2392_v18, %v2392_v18 }
 0x1f0   :  { %v419_v23 = vpop.f32.mrf.mxu1 }
 0x1f1   :  { %v2400_v24 = vmax.f32 %v419_v23, 0.0  ;;  %511 = vadd.xlane.f32.xlu0 %v495_v22  ;;  %v498_v26 = vmul.f32 %v2396_v21, %v2396_v21 }
 0x1f2   :  { %v1900_v28 = vpop.f32.mrf.mxu1 }
 0x1f3   :  { %517 = vadd.xlane.f32.xlu1 %v498_v26  ;;  %v496_v29 = vmul.f32 %v2400_v24, %v2400_v24  ;;  %v2408_v33 = vmax.f32 %v1900_v28, 0.0 }
 0x1f4   :  { %v432_v30 = vpop.f32.mrf.mxu1 }
 0x1f5   :  { %v2406_v31 = vmax.f32 %v432_v30, 0.0  ;;  %513 = vadd.xlane.f32.xlu0 %v496_v29  ;;  %v501_v40 = vmul.f32 %v2408_v33, %v2408_v33 }
 0x1f6   :  { %v1901_v32 = vpop.f32.mrf.mxu1 }
 0x1f7   :  { %v499_v34 = vmul.f32 %v2406_v31, %v2406_v31  ;;  %v2417_v39 = vmax.f32 %v1901_v32, 0.0 }
 0x1f8   :  { %v435_v35 = vpop.f32.mrf.mxu1 }
 0x1f9   :  { %v2412_v36 = vmax.f32 %v435_v35, 0.0  ;;  %519 = vadd.xlane.f32.xlu0 %v499_v34  ;;  %v502_v47 = vmul.f32 %v2417_v39, %v2417_v39 }
 0x1fa   :  { %v1904_v37 = vpop.f32.mrf.mxu1 }
 0x1fb   :  { %v500_v41 = vmul.f32 %v2412_v36, %v2412_v36  ;;  %v2428_v46 = vmax.f32 %v1904_v37, 0.0 }
 0x1fc   :  { %v448_v42 = vpop.f32.mrf.mxu1 }
 0x1fd   :  { %v2423_v43 = vmax.f32 %v448_v42, 0.0  ;;  %523 = vadd.xlane.f32.xlu0 %v501_v40  ;;  %521 = vadd.xlane.f32.xlu1 %v500_v41  ;;  %v505_v54 = vmul.f32 %v2428_v46, %v2428_v46 }
 0x1fe   :  { %v1905_v44 = vpop.f32.mrf.mxu1 }
 0x1ff   :  { %v503_v48 = vmul.f32 %v2423_v43, %v2423_v43  ;;  %v2439_v53 = vmax.f32 %v1905_v44, 0.0 }
 0x200   :  { %v451_v49 = vpop.f32.mrf.mxu1 }
 0x201   :  { %v2434_v50 = vmax.f32 %v451_v49, 0.0  ;;  %525 = vadd.xlane.f32.xlu1 %v502_v47  ;;  %527 = vadd.xlane.f32.xlu0 %v503_v48  ;;  %v506_v60 = vmul.f32 %v2439_v53, %v2439_v53 }
 0x202   :  { %v1908_v51 = vpop.f32.mrf.mxu1 }
 0x203   :  { %v504_v55 = vmul.f32 %v2434_v50, %v2434_v50  ;;  %v2447_v59 = vmax.f32 %v1908_v51, 0.0 }
 0x204   :  { %v464_v56 = vpop.f32.mrf.mxu1 }
 0x205   :  { %v2445_v57 = vmax.f32 %v464_v56, 0.0  ;;  %531 = vadd.xlane.f32.xlu0 %v505_v54  ;;  %529 = vadd.xlane.f32.xlu1 %v504_v55  ;;  %v509_v3 = vmul.f32 %v2447_v59, %v2447_v59 }
 0x206   :  { %v1909_v58 = vpop.f32.mrf.mxu1 }
 0x207   :  { %v507_v61 = vmul.f32 %v2445_v57, %v2445_v57  ;;  %v2458_v2 = vmax.f32 %v1909_v58, 0.0 }
 0x208   :  { %v467_v63 = vpop.f32.mrf.mxu1 }
 0x209   :  { %v2456_v1 = vmax.f32 %v467_v63, 0.0  ;;  %533 = vadd.xlane.f32.xlu1 %v506_v60  ;;  %535 = vadd.xlane.f32.xlu0 %v507_v61  ;;  %v510_v13 = vmul.f32 %v2458_v2, %v2458_v2 }
 0x20b   :  { %v508_v4 = vmul.f32 %v2456_v1, %v2456_v1 }
 0x20d   :  { %539 = vadd.xlane.f32.xlu0 %v509_v3  ;;  %537 = vadd.xlane.f32.xlu1 %v508_v4 }
 0x211   :  { %541 = vadd.xlane.f32.xlu1 %v510_v13 }
 0x278   :  { %v516_v15 = vpop.xlane.xlu1 %515 }
 0x279   :  { %v545_v20 = vadd.f32 1e-12, %v516_v15 }
 0x27a   :  { %v512_v17 = vpop.xlane.xlu0 %511 }
 0x27b   :  { %v543_v19 = vadd.f32 1e-12, %v512_v17 }
 0x27c   :  { %v518_v22 = vpop.xlane.xlu1 %517 }
 0x27d   :  { %v546_v23 = vadd.f32 1e-12, %v518_v22  ;;  %2142 = vrsqrt.f32 %v543_v19 }
 0x27e   :  { %v514_v26 = vpop.xlane.xlu0 %513 }
 0x27f   :  { %2144 = vrsqrt.f32 %v546_v23  ;;  %v544_v28 = vadd.f32 1e-12, %v514_v26 }
 0x280   :  { %2146 = vrsqrt.f32 %v545_v20 }
 0x281   :  { %2148 = vrsqrt.f32 %v544_v28 }
 0x282   :  { %v520_v29 = vpop.xlane.xlu0 %519 }
 0x283   :  { %v547_v30 = vadd.f32 1e-12, %v520_v29 }
 0x285   :  { %2150 = vrsqrt.f32 %v547_v30 }
 0x286   :  { %v524_v32 = vpop.xlane.xlu0 %523  ;;  %v522_v34 = vpop.xlane.xlu1 %521 }
 0x287   :  { %v549_v35 = vadd.f32 1e-12, %v524_v32  ;;  %v548_v37 = vadd.f32 1e-12, %v522_v34 }
 0x289   :  { %2152 = vrsqrt.f32 %v548_v37 }
 0x28a   :  { %v526_v38 = vpop.xlane.xlu1 %525  ;;  %v528_v40 = vpop.xlane.xlu0 %527  ;;  %2154 = vrsqrt.f32 %v549_v35 }
 0x28b   :  { %v2143_v41 = vpop.eup %2142  ;;  %v550_v42 = vadd.f32 1e-12, %v526_v38  ;;  %v551_v45 = vadd.f32 1e-12, %v528_v40 }
 0x28c   :  { %v2145_v44 = vpop.eup %2144  ;;  %v575_v56 = vmul.f32 %v2143_v41, %v2392_v18 }
 0x28d   :  { %v2147_v47 = vpop.eup %2146  ;;  %2156 = vrsqrt.f32 %v550_v42  ;;  %v578_v52 = vmul.f32 %v2145_v44, %v2396_v21 }
 0x28e   :  { %v2149_v48 = vpop.eup %2148  ;;  %v532_v49 = vpop.xlane.xlu0 %531  ;;  %2158 = vrsqrt.f32 %v551_v45  ;;  %v577_v60 = vmul.f32 %v2147_v47, %v2390_v16 }
 0x28f   :  { %v530_v51 = vpop.xlane.xlu1 %529  ;;  %v553_v54 = vadd.f32 1e-12, %v532_v49  ;;  %v576_v58 = vmul.f32 %v2149_v48, %v2400_v24 }
 0x290   :  { %v552_v55 = vadd.f32 1e-12, %v530_v51  ;;  %v592_v3 = vpack.c.bf16 %v578_v52, %v577_v60 }
 0x291   :  { %v591_v61 = vpack.c.bf16 %v576_v58, %v575_v56 }
 0x292   :  { %2160 = vrsqrt.f32 %v552_v55  ;;  %v536_v63 = vpop.xlane.xlu0 %535  ;;  %v2151_v21 = vpop.eup %2150 }
 0x293   :  { %v534_v62 = vpop.xlane.xlu1 %533  ;;  %2162 = vrsqrt.f32 %v553_v54  ;;  %1926 = vmatprep.mubr.bf16.mxu0 %v591_v61  ;;  %v555_v5 = vadd.f32 1e-12, %v536_v63  ;;  %v579_v16 = vmul.f32 %v2151_v21, %v2406_v31  ;;  %v617_v63 = vsub.s32 1, %v2350_v25 }
 0x294   :  { %v554_v4 = vadd.f32 1e-12, %v534_v62  ;;  %1927 = vmatmul.mubr.bf16.vlgmr.msra.gmra.mxu0 %v592_v3 }
 0x296   :  { %2164 = vrsqrt.f32 %v554_v4  ;;  %v540_v13 = vpop.xlane.xlu0 %539  ;;  %v2153_v18 = vpop.eup %2152 }
 0x297   :  { %v538_v14 = vpop.xlane.xlu1 %537  ;;  %v557_v15 = vadd.f32 1e-12, %v540_v13  ;;  %v2155_v17 = vpop.eup %2154  ;;  %2166 = vrsqrt.f32 %v555_v5  ;;  %v580_v19 = vmul.f32 %v2153_v18, %v2412_v36 }
 0x298   :  { %v556_v24 = vadd.f32 1e-12, %v538_v14  ;;  %v581_v28 = vmul.f32 %v2155_v17, %v2408_v33 }
 0x299   :  { %v593_v23 = vpack.c.bf16 %v580_v19, %v579_v16 }
 0x29a   :  { %v2157_v20 = vpop.eup %2156  ;;  %2168 = vrsqrt.f32 %v556_v24 }
 0x29b   :  { %v542_v22 = vpop.xlane.xlu1 %541  ;;  %2170 = vrsqrt.f32 %v557_v15  ;;  %v582_v29 = vmul.f32 %v2157_v20, %v2417_v39  ;;  %1930 = vmatprep.mubr.bf16.mxu0 %v593_v23  ;;  %v2159_v30 = vpop.eup %2158 }
 0x29c   :  { %v558_v26 = vadd.f32 1e-12, %v542_v22  ;;  %v583_v31 = vmul.f32 %v2159_v30, %v2423_v43 }
 0x29d   :  { %v594_v32 = vpack.c.bf16 %v582_v29, %v581_v28 }
 0x29e   :  { %2172 = vrsqrt.f32 %v558_v26 }
 0x29f   :  { %v2161_v34 = vpop.eup %2160  ;;  %1931 = vmatmul.mubr.bf16.gmra.mxu0 %v594_v32 }
 0x2a0   :  { %v2163_v35 = vpop.eup %2162  ;;  %v584_v36 = vmul.f32 %v2161_v34, %v2434_v50 }
 0x2a1   :  { %v585_v40 = vmul.f32 %v2163_v35, %v2428_v46 }
 0x2a2   :  { %v595_v38 = vpack.c.bf16 %v584_v36, %v583_v31 }
 0x2a3   :  { %v2165_v37 = vpop.eup %2164 }
 0x2a4   :  { %v586_v41 = vmul.f32 %v2165_v37, %v2439_v53  ;;  %1934 = vmatprep.mubr.bf16.mxu0 %v595_v38  ;;  %v2167_v33 = vpop.eup %2166 }
 0x2a5   :  { %v587_v45 = vmul.f32 %v2167_v33, %v2445_v57 }
 0x2a6   :  { %v596_v39 = vpack.c.bf16 %v586_v41, %v585_v40  ;;  %v2126_v41 = vld [vmem:[%s2734_s3 + $0x78] sm:$0xff]  }
 0x2a7   :  { %v2169_v42 = vpop.eup %2168  ;;  %1974 = vmatprep.subr.bf16.mxu0 %v2126_v41 }
 0x2a8   :  { %1935 = vmatmul.mubr.bf16.gmra.mxu0 %v596_v39  ;;  %v2171_v44 = vpop.eup %2170  ;;  %v588_v47 = vmul.f32 %v2169_v42, %v2456_v1 }
 0x2a9   :  { %v589_v50 = vmul.f32 %v2171_v44, %v2447_v59  ;;  %1975 = vmatpush3.bf16.msra.mxu0 %v2126_v41 }
 0x2aa   :  { %v597_v43 = vpack.c.bf16 %v588_v47, %v587_v45 }
 0x2ab   :  { %v2173_v48 = vpop.eup %2172 }
 0x2ac   :  { %v590_v49 = vmul.f32 %v2173_v48, %v2458_v2  ;;  %1938 = vmatprep.mubr.bf16.mxu0 %v597_v43  ;;  %v618_v2 = vrot.slane %v2356_v27, %v617_v63 }
 0x2ae   :  { %v598_v46 = vpack.c.bf16 %v590_v49, %v589_v50 }
 0x2b0   :  { %1939 = vmatmul.mubr.bf16.gmra.mxu0 %v598_v46 }
 0x354   :  { %v1928_v53 = vpop.f32.mrf.mxu0 }
 0x355   :  { %v710_v31 = vadd.f32 %v1928_v53, %v618_v2 }
 0x356   :  { %v701_v51 = vpop.f32.mrf.mxu0 }
 0x357   :  { %v702_v38 = vadd.f32 %v701_v51, %v618_v2 }
 0x358   :  { %v1929_v52 = vpop.f32.mrf.mxu0 }
 0x359   :  { %v713_v34 = vadd.f32 %v1929_v52, %v618_v2 }
 0x35a   :  { %v704_v54 = vpop.f32.mrf.mxu0 }
 0x35b   :  { %v765_v36 = vpack.c.bf16 %v713_v34, %v710_v31  ;;  %v705_v37 = vadd.f32 %v704_v54, %v618_v2  ;;  %v2131_v34 = vld [vmem:[%s2734_s3 + $0x50] sm:$0xff]  }
 0x35d   :  { %v764_v40 = vpack.c.bf16 %v705_v37, %v702_v38  ;;  %v2132_v37 = vld [vmem:[%s2734_s3 + $0x48] sm:$0xff]  }
 0x35f   :  { %v1932_v55 = vpop.f32.mrf.mxu0 }
 0x360   :  { %v726_v28 = vadd.f32 %v1932_v55, %v618_v2 }
 0x361   :  { %v717_v56 = vpop.f32.mrf.mxu0 }
 0x362   :  { %v718_v32 = vadd.f32 %v717_v56, %v618_v2 }
 0x363   :  { %v1933_v58 = vpop.f32.mrf.mxu0 }
 0x364   :  { %v729_v23 = vadd.f32 %v1933_v58, %v618_v2 }
 0x365   :  { %v720_v60 = vpop.f32.mrf.mxu0 }
 0x366   :  { %v767_v29 = vpack.c.bf16 %v729_v23, %v726_v28  ;;  %v721_v30 = vadd.f32 %v720_v60, %v618_v2  ;;  %v2130_v23 = vld [vmem:[%s2734_s3 + $0x58] sm:$0xff]  }
 0x368   :  { %v1936_v57 = vpop.f32.mrf.mxu0  ;;  %v766_v35 = vpack.c.bf16 %v721_v30, %v718_v32 }
 0x369   :  { %v742_v16 = vadd.f32 %v1936_v57, %v618_v2  ;;  %v2127_v57 = vld [vmem:[%s2734_s3 + $0x70] sm:$0xff]  }
 0x36a   :  { %v733_v61 = vpop.f32.mrf.mxu0  ;;  %1976 = vmatprep.subr.bf16.mxu0 %v2127_v57 }
 0x36b   :  { %v734_v22 = vadd.f32 %v733_v61, %v618_v2  ;;  %1977 = vmatpush3.bf16.msra.mxu0 %v2127_v57 }
 0x36c   :  { %v1937_v1 = vpop.f32.mrf.mxu0 }
 0x36d   :  { %v745_v24 = vadd.f32 %v1937_v1, %v618_v2 }
 0x36e   :  { %v736_v62 = vpop.f32.mrf.mxu0 }
 0x36f   :  { %v769_v19 = vpack.c.bf16 %v745_v24, %v742_v16  ;;  %v737_v20 = vadd.f32 %v736_v62, %v618_v2 }
 0x370   :  { %v1940_v59 = vpop.f32.mrf.mxu0 }
 0x371   :  { %v758_v5 = vadd.f32 %v1940_v59, %v618_v2  ;;  %v768_v26 = vpack.c.bf16 %v737_v20, %v734_v22 }
 0x372   :  { %v749_v3 = vpop.f32.mrf.mxu0 }
 0x373   :  { %v750_v14 = vadd.f32 %v749_v3, %v618_v2 }
 0x374   :  { %v1941_v4 = vpop.f32.mrf.mxu0 }
 0x375   :  { %v761_v21 = vadd.f32 %v1941_v4, %v618_v2 }
 0x376   :  { %v752_v13 = vpop.f32.mrf.mxu0 }
 0x377   :  { %v771_v18 = vpack.c.bf16 %v761_v21, %v758_v5  ;;  %v753_v15 = vadd.f32 %v752_v13, %v618_v2  ;;  %v2128_v2 = vld [vmem:[%s2734_s3 + $0x68] sm:$0xff]  }
 0x378   :  { %1978 = vmatprep.subr.bf16.mxu0 %v2128_v2 }
 0x379   :  { %v770_v17 = vpack.c.bf16 %v753_v15, %v750_v14  ;;  %1942 = vmatprep.subr.bf16.mxu1 %v771_v18  ;;  %1979 = vmatpush3.bf16.msra.mxu0 %v2128_v2  ;;  %v2129_v15 = vld [vmem:[%s2734_s3 + $0x60] sm:$0xff]  }
 0x37a   :  { %1943 = vmatpush3.bf16.msra.mxu1 %v771_v18  ;;  %1980 = vmatprep.subr.bf16.mxu0 %v2129_v15 }
 0x37b   :  { %1944 = vmatprep.subr.bf16.mxu1 %v770_v17 }
 0x37d   :  { %1981 = vmatpush3.bf16.msra.mxu0 %v2129_v15 }
 0x37e   :  { %1945 = vmatpush3.bf16.msra.mxu1 %v770_v17  ;;  %1982 = vmatprep.subr.bf16.mxu0 %v2130_v23 }
 0x37f   :  { %1946 = vmatprep.subr.bf16.mxu1 %v769_v19 }
 0x381   :  { %1983 = vmatpush3.bf16.msra.mxu0 %v2130_v23 }
 0x382   :  { %1947 = vmatpush3.bf16.msra.mxu1 %v769_v19  ;;  %1984 = vmatprep.subr.bf16.mxu0 %v2131_v34 }
 0x383   :  { %1948 = vmatprep.subr.bf16.mxu1 %v768_v26 }
 0x385   :  { %1985 = vmatpush3.bf16.msra.mxu0 %v2131_v34 }
 0x386   :  { %1949 = vmatpush3.bf16.msra.mxu1 %v768_v26  ;;  %1986 = vmatprep.subr.bf16.mxu0 %v2132_v37 }
 0x387   :  { %1950 = vmatprep.subr.bf16.mxu1 %v767_v29 }
 0x389   :  { %1987 = vmatpush3.bf16.msra.mxu0 %v2132_v37 }
 0x38a   :  { %1951 = vmatpush3.bf16.msra.mxu1 %v767_v29 }
 0x38b   :  { %1952 = vmatprep.subr.bf16.mxu1 %v766_v35 }
 0x38e   :  { %1953 = vmatpush3.bf16.msra.mxu1 %v766_v35 }
 0x38f   :  { %1954 = vmatprep.subr.bf16.mxu1 %v765_v36 }
 0x392   :  { %1955 = vmatpush3.bf16.msra.mxu1 %v765_v36 }
 0x393   :  { %1956 = vmatprep.subr.bf16.mxu1 %v764_v40 }
 0x396   :  { %1957 = vmatpush3.bf16.msra.mxu1 %v764_v40  ;;  %v2133_v40 = vld [vmem:[%s2734_s3 + $0x40] sm:$0xff]  }
 0x397   :  { %1988 = vmatprep.subr.bf16.mxu0 %v2133_v40 }
 0x398   :  { %1989 = vmatpush3.bf16.msra.mxu0 %v2133_v40 }
 0x399   :  { %1959 = vmatmul.mubr.bf16.vlgmr.msra.gmra.mxu1 %v2362_v6 }
 0x39a   :  { %1962 = vmatprep.mubr.bf16.mxu1 %v2364_v7 }
 0x3a1   :  { %1963 = vmatmul.mubr.bf16.gmra.mxu1 %v2368_v8 }
 0x3a2   :  { %1966 = vmatprep.mubr.bf16.mxu1 %v2370_v9 }
 0x3a9   :  { %1967 = vmatmul.mubr.bf16.gmra.mxu1 %v2374_v10 }
 0x3aa   :  { %1970 = vmatprep.mubr.bf16.mxu1 %v2376_v11 }
 0x3b1   :  { %1971 = vmatmul.mubr.bf16.gmra.mxu1 %v2380_v12 }
 0x3b2   :  { %2022 = vmatprep.mubr.bf16.mxu1 %v2359_v0 }
 0x459   :  { %v1960_v6 = vpop.f32.mrf.mxu1 }
 0x45a   :  { %v2503_v44 = vmax.f32 %v1960_v6, 0.0 }
 0x45b   :  { %v806_v33 = vpop.f32.mrf.mxu1 }
 0x45c   :  { %v2501_v39 = vmax.f32 %v806_v33, 0.0  ;;  %v887_v50 = vmul.f32 %v2503_v44, %v2503_v44 }
 0x45d   :  { %v1961_v42 = vpop.f32.mrf.mxu1 }
 0x45e   :  { %v885_v45 = vmul.f32 %v2501_v39, %v2501_v39  ;;  %v2509_v43 = vmax.f32 %v1961_v42, 0.0 }
 0x45f   :  { %v809_v47 = vpop.f32.mrf.mxu1 }
 0x460   :  { %v2507_v48 = vmax.f32 %v809_v47, 0.0  ;;  %901 = vadd.xlane.f32.xlu0 %v885_v45  ;;  %v888_v54 = vmul.f32 %v2509_v43, %v2509_v43 }
 0x461   :  { %v1964_v0 = vpop.f32.mrf.mxu1 }
 0x462   :  { %v886_v49 = vmul.f32 %v2507_v48, %v2507_v48  ;;  %v2517_v52 = vmax.f32 %v1964_v0, 0.0 }
 0x463   :  { %v822_v46 = vpop.f32.mrf.mxu1 }
 0x464   :  { %v2515_v53 = vmax.f32 %v822_v46, 0.0  ;;  %905 = vadd.xlane.f32.xlu0 %v887_v50  ;;  %903 = vadd.xlane.f32.xlu1 %v886_v49  ;;  %v891_v1 = vmul.f32 %v2517_v52, %v2517_v52 }
 0x465   :  { %v1965_v51 = vpop.f32.mrf.mxu1 }
 0x466   :  { %v889_v55 = vmul.f32 %v2515_v53, %v2515_v53  ;;  %v2528_v61 = vmax.f32 %v1965_v51, 0.0 }
 0x467   :  { %v825_v56 = vpop.f32.mrf.mxu1 }
 0x468   :  { %v2523_v58 = vmax.f32 %v825_v56, 0.0  ;;  %907 = vadd.xlane.f32.xlu1 %v888_v54  ;;  %909 = vadd.xlane.f32.xlu0 %v889_v55  ;;  %v892_v5 = vmul.f32 %v2528_v61, %v2528_v61 }
 0x469   :  { %v1968_v60 = vpop.f32.mrf.mxu1 }
 0x46a   :  { %v890_v62 = vmul.f32 %v2523_v58, %v2523_v58  ;;  %v2539_v4 = vmax.f32 %v1968_v60, 0.0 }
 0x46b   :  { %v838_v63 = vpop.f32.mrf.mxu1 }
 0x46c   :  { %v2534_v59 = vmax.f32 %v838_v63, 0.0  ;;  %913 = vadd.xlane.f32.xlu0 %v891_v1  ;;  %911 = vadd.xlane.f32.xlu1 %v890_v62  ;;  %v895_v17 = vmul.f32 %v2539_v4, %v2539_v4 }
 0x46d   :  { %v1969_v3 = vpop.f32.mrf.mxu1 }
 0x46e   :  { %v893_v21 = vmul.f32 %v2534_v59, %v2534_v59  ;;  %v2550_v24 = vmax.f32 %v1969_v3, 0.0 }
 0x46f   :  { %v841_v13 = vpop.f32.mrf.mxu1 }
 0x470   :  { %v2545_v14 = vmax.f32 %v841_v13, 0.0  ;;  %915 = vadd.xlane.f32.xlu1 %v892_v5  ;;  %917 = vadd.xlane.f32.xlu0 %v893_v21  ;;  %v896_v28 = vmul.f32 %v2550_v24, %v2550_v24 }
 0x471   :  { %v1972_v18 = vpop.f32.mrf.mxu1 }
 0x472   :  { %v894_v16 = vmul.f32 %v2545_v14, %v2545_v14  ;;  %v2561_v26 = vmax.f32 %v1972_v18, 0.0 }
 0x473   :  { %v854_v19 = vpop.f32.mrf.mxu1 }
 0x474   :  { %v2556_v20 = vmax.f32 %v854_v19, 0.0  ;;  %921 = vadd.xlane.f32.xlu0 %v895_v17  ;;  %919 = vadd.xlane.f32.xlu1 %v894_v16  ;;  %v899_v31 = vmul.f32 %v2561_v26, %v2561_v26 }
 0x475   :  { %v1973_v22 = vpop.f32.mrf.mxu1 }
 0x476   :  { %v897_v29 = vmul.f32 %v2556_v20, %v2556_v20  ;;  %v2572_v35 = vmax.f32 %v1973_v22, 0.0 }
 0x477   :  { %v857_v30 = vpop.f32.mrf.mxu1 }
 0x478   :  { %v2567_v32 = vmax.f32 %v857_v30, 0.0  ;;  %923 = vadd.xlane.f32.xlu1 %v896_v28  ;;  %925 = vadd.xlane.f32.xlu0 %v897_v29  ;;  %v900_v38 = vmul.f32 %v2572_v35, %v2572_v35 }
 0x47a   :  { %v898_v36 = vmul.f32 %v2567_v32, %v2567_v32 }
 0x47c   :  { %929 = vadd.xlane.f32.xlu0 %v899_v31  ;;  %927 = vadd.xlane.f32.xlu1 %v898_v36 }
 0x480   :  { %931 = vadd.xlane.f32.xlu1 %v900_v38 }
 0x4e9   :  { %v902_v41 = vpop.xlane.xlu0 %901 }
 0x4ea   :  { %v933_v6 = vadd.f32 1e-12, %v902_v41 }
 0x4ec   :  { %2174 = vrsqrt.f32 %v933_v6 }
 0x4ed   :  { %v906_v33 = vpop.xlane.xlu0 %905  ;;  %v904_v42 = vpop.xlane.xlu1 %903 }
 0x4ee   :  { %v935_v45 = vadd.f32 1e-12, %v906_v33  ;;  %v934_v47 = vadd.f32 1e-12, %v904_v42 }
 0x4f0   :  { %2176 = vrsqrt.f32 %v934_v47 }
 0x4f1   :  { %v908_v0 = vpop.xlane.xlu1 %907  ;;  %v910_v50 = vpop.xlane.xlu0 %909  ;;  %2178 = vrsqrt.f32 %v935_v45 }
 0x4f2   :  { %v936_v49 = vadd.f32 1e-12, %v908_v0  ;;  %v937_v46 = vadd.f32 1e-12, %v910_v50 }
 0x4f4   :  { %2180 = vrsqrt.f32 %v936_v49 }
 0x4f5   :  { %v914_v51 = vpop.xlane.xlu0 %913  ;;  %v912_v54 = vpop.xlane.xlu1 %911  ;;  %2182 = vrsqrt.f32 %v937_v46 }
 0x4f6   :  { %v939_v55 = vadd.f32 1e-12, %v914_v51  ;;  %v938_v56 = vadd.f32 1e-12, %v912_v54 }
 0x4f8   :  { %2184 = vrsqrt.f32 %v938_v56 }
 0x4f9   :  { %v916_v60 = vpop.xlane.xlu1 %915  ;;  %v918_v57 = vpop.xlane.xlu0 %917  ;;  %2186 = vrsqrt.f32 %v939_v55 }
 0x4fa   :  { %v940_v1 = vadd.f32 1e-12, %v916_v60  ;;  %v941_v62 = vadd.f32 1e-12, %v918_v57  ;;  %v2175_v63 = vpop.eup %2174 }
 0x4fb   :  { %v965_v15 = vmul.f32 %v2175_v63, %v2501_v39 }
 0x4fc   :  { %2188 = vrsqrt.f32 %v940_v1 }
 0x4fd   :  { %v922_v3 = vpop.xlane.xlu0 %921  ;;  %v920_v2 = vpop.xlane.xlu1 %919  ;;  %2190 = vrsqrt.f32 %v941_v62 }
 0x4fe   :  { %v2177_v5 = vpop.eup %2176  ;;  %v943_v21 = vadd.f32 1e-12, %v922_v3  ;;  %v942_v13 = vadd.f32 1e-12, %v920_v2 }
 0x4ff   :  { %v2179_v18 = vpop.eup %2178  ;;  %v966_v17 = vmul.f32 %v2177_v5, %v2507_v48 }
 0x500   :  { %2192 = vrsqrt.f32 %v942_v13  ;;  %v967_v29 = vmul.f32 %v2179_v18, %v2503_v44 }
 0x501   :  { %v2181_v16 = vpop.eup %2180  ;;  %v924_v19 = vpop.xlane.xlu1 %923  ;;  %v981_v23 = vpack.c.bf16 %v966_v17, %v965_v15  ;;  %2194 = vrsqrt.f32 %v943_v21 }
 0x502   :  { %v926_v22 = vpop.xlane.xlu0 %925  ;;  %v944_v28 = vadd.f32 1e-12, %v924_v19  ;;  %v968_v30 = vmul.f32 %v2181_v16, %v2509_v43  ;;  %v2183_v31 = vpop.eup %2182 }
 0x503   :  { %v945_v34 = vadd.f32 1e-12, %v926_v22  ;;  %1990 = vmatprep.mubr.bf16.mxu0 %v981_v23  ;;  %v969_v6 = vmul.f32 %v2183_v31, %v2515_v53  ;;  %v1008_v23 = vsub.s32 2, %v2350_v25 }
 0x504   :  { %2196 = vrsqrt.f32 %v944_v28  ;;  %v982_v36 = vpack.c.bf16 %v968_v30, %v967_v29 }
 0x505   :  { %v928_v39 = vpop.xlane.xlu1 %927  ;;  %v2185_v38 = vpop.eup %2184  ;;  %2198 = vrsqrt.f32 %v945_v34 }
 0x506   :  { %v930_v37 = vpop.xlane.xlu0 %929  ;;  %v946_v40 = vadd.f32 1e-12, %v928_v39  ;;  %1991 = vmatmul.mubr.bf16.vlgmr.msra.gmra.mxu0 %v982_v36  ;;  %v2187_v41 = vpop.eup %2186  ;;  %v970_v33 = vmul.f32 %v2185_v38, %v2523_v58 }
 0x507   :  { %v947_v48 = vadd.f32 1e-12, %v930_v37  ;;  %v971_v47 = vmul.f32 %v2187_v41, %v2517_v52 }
 0x508   :  { %2200 = vrsqrt.f32 %v946_v40  ;;  %v983_v42 = vpack.c.bf16 %v970_v33, %v969_v6 }
 0x509   :  { %v2189_v44 = vpop.eup %2188  ;;  %v932_v43 = vpop.xlane.xlu1 %931  ;;  %2202 = vrsqrt.f32 %v947_v48 }
 0x50a   :  { %v948_v45 = vadd.f32 1e-12, %v932_v43  ;;  %v972_v0 = vmul.f32 %v2189_v44, %v2528_v61  ;;  %1994 = vmatprep.mubr.bf16.mxu0 %v983_v42  ;;  %v2191_v50 = vpop.eup %2190 }
 0x50b   :  { %v973_v53 = vmul.f32 %v2191_v50, %v2534_v59 }
 0x50c   :  { %2204 = vrsqrt.f32 %v948_v45  ;;  %v984_v49 = vpack.c.bf16 %v972_v0, %v971_v47 }
 0x50d   :  { %v2193_v46 = vpop.eup %2192 }
 0x50e   :  { %1995 = vmatmul.mubr.bf16.gmra.mxu0 %v984_v49  ;;  %v2195_v51 = vpop.eup %2194  ;;  %v974_v58 = vmul.f32 %v2193_v46, %v2545_v14 }
 0x50f   :  { %v975_v56 = vmul.f32 %v2195_v51, %v2539_v4 }
 0x510   :  { %v985_v55 = vpack.c.bf16 %v974_v58, %v973_v53 }
 0x511   :  { %v2197_v54 = vpop.eup %2196 }
 0x512   :  { %v976_v60 = vmul.f32 %v2197_v54, %v2550_v24  ;;  %1998 = vmatprep.mubr.bf16.mxu0 %v985_v55  ;;  %v2199_v52 = vpop.eup %2198  ;;  %v2242_v55 = vld [vmem:[#allocation2 + $0x8] sm:$0xff]  }
 0x513   :  { %v977_v62 = vmul.f32 %v2199_v52, %v2556_v20 }
 0x514   :  { %v986_v61 = vpack.c.bf16 %v976_v60, %v975_v56  ;;  %v2134_v56 = vld [vmem:[%s2734_s3 + $0xb8] sm:$0xff]  }
 0x515   :  { %v2201_v57 = vpop.eup %2200  ;;  %2038 = vmatprep.subr.bf16.mxu0 %v2134_v56 }
 0x516   :  { %1999 = vmatmul.mubr.bf16.gmra.mxu0 %v986_v61  ;;  %v2203_v1 = vpop.eup %2202  ;;  %v978_v63 = vmul.f32 %v2201_v57, %v2567_v32 }
 0x517   :  { %v979_v14 = vmul.f32 %v2203_v1, %v2561_v26  ;;  %2039 = vmatpush3.bf16.msra.mxu0 %v2134_v56 }
 0x518   :  { %v987_v59 = vpack.c.bf16 %v978_v63, %v977_v62 }
 0x519   :  { %v2205_v3 = vpop.eup %2204 }
 0x51a   :  { %v980_v2 = vmul.f32 %v2205_v3, %v2572_v35  ;;  %2002 = vmatprep.mubr.bf16.mxu0 %v987_v59  ;;  %v1009_v35 = vrot.slane %v2356_v27, %v1008_v23 }
 0x51c   :  { %v988_v4 = vpack.c.bf16 %v980_v2, %v979_v14 }
 0x51e   :  { %2003 = vmatmul.mubr.bf16.gmra.mxu0 %v988_v4 }
 0x5c6   :  { %v1992_v24 = vpop.f32.mrf.mxu0 }
 0x5c7   :  { %v1101_v46 = vadd.f32 %v1992_v24, %v1009_v35 }
 0x5c8   :  { %v1092_v5 = vpop.f32.mrf.mxu0 }
 0x5c9   :  { %v1093_v58 = vadd.f32 %v1092_v5, %v1009_v35 }
 0x5ca   :  { %v1993_v21 = vpop.f32.mrf.mxu0 }
 0x5cb   :  { %v1104_v50 = vadd.f32 %v1993_v21, %v1009_v35 }
 0x5cc   :  { %v1095_v13 = vpop.f32.mrf.mxu0 }
 0x5cd   :  { %v1156_v51 = vpack.c.bf16 %v1104_v50, %v1101_v46  ;;  %v1096_v53 = vadd.f32 %v1095_v13, %v1009_v35  ;;  %v2135_v13 = vld [vmem:[%s2734_s3 + $0xb0] sm:$0xff]  }
 0x5ce   :  { %v1996_v18 = vpop.f32.mrf.mxu0  ;;  %2040 = vmatprep.subr.bf16.mxu0 %v2135_v13 }
 0x5cf   :  { %v1117_v42 = vadd.f32 %v1996_v18, %v1009_v35  ;;  %v1155_v54 = vpack.c.bf16 %v1096_v53, %v1093_v58  ;;  %2041 = vmatpush3.bf16.msra.mxu0 %v2135_v13 }
 0x5d0   :  { %v1108_v15 = vpop.f32.mrf.mxu0 }
 0x5d1   :  { %v1109_v0 = vadd.f32 %v1108_v15, %v1009_v35 }
 0x5d2   :  { %v1997_v17 = vpop.f32.mrf.mxu0 }
 0x5d3   :  { %v1120_v44 = vadd.f32 %v1997_v17, %v1009_v35 }
 0x5d4   :  { %v1111_v16 = vpop.f32.mrf.mxu0 }
 0x5d5   :  { %v1158_v45 = vpack.c.bf16 %v1120_v44, %v1117_v42  ;;  %v1112_v47 = vadd.f32 %v1111_v16, %v1009_v35 }
 0x5d6   :  { %v2000_v20 = vpop.f32.mrf.mxu0 }
 0x5d7   :  { %v1133_v40 = vadd.f32 %v2000_v20, %v1009_v35  ;;  %v1157_v49 = vpack.c.bf16 %v1112_v47, %v1109_v0  ;;  %v2140_v0 = vld [vmem:[%s2734_s3 + $0x88] sm:$0xff]  }
 0x5d8   :  { %v1124_v19 = vpop.f32.mrf.mxu0 }
 0x5d9   :  { %v1125_v33 = vadd.f32 %v1124_v19, %v1009_v35 }
 0x5da   :  { %v2001_v32 = vpop.f32.mrf.mxu0 }
 0x5db   :  { %v1136_v38 = vadd.f32 %v2001_v32, %v1009_v35  ;;  %v2136_v32 = vld [vmem:[%s2734_s3 + $0xa8] sm:$0xff]  }
 0x5dc   :  { %v1127_v22 = vpop.f32.mrf.mxu0  ;;  %2042 = vmatprep.subr.bf16.mxu0 %v2136_v32 }
 0x5dd   :  { %v1160_v41 = vpack.c.bf16 %v1136_v38, %v1133_v40  ;;  %v1128_v6 = vadd.f32 %v1127_v22, %v1009_v35  ;;  %2043 = vmatpush3.bf16.msra.mxu0 %v2136_v32 }
 0x5de   :  { %v2004_v26 = vpop.f32.mrf.mxu0 }
 0x5df   :  { %v1149_v30 = vadd.f32 %v2004_v26, %v1009_v35  ;;  %v1159_v43 = vpack.c.bf16 %v1128_v6, %v1125_v33 }
 0x5e0   :  { %v1140_v28 = vpop.f32.mrf.mxu0 }
 0x5e1   :  { %v1141_v36 = vadd.f32 %v1140_v28, %v1009_v35 }
 0x5e2   :  { %v2005_v29 = vpop.f32.mrf.mxu0 }
 0x5e3   :  { %v1152_v34 = vadd.f32 %v2005_v29, %v1009_v35 }
 0x5e4   :  { %v1143_v31 = vpop.f32.mrf.mxu0 }
 0x5e5   :  { %v1162_v37 = vpack.c.bf16 %v1152_v34, %v1149_v30  ;;  %v1144_v39 = vadd.f32 %v1143_v31, %v1009_v35  ;;  %v2137_v30 = vld [vmem:[%s2734_s3 + $0xa0] sm:$0xff]  }
 0x5e6   :  { %2044 = vmatprep.subr.bf16.mxu0 %v2137_v30 }
 0x5e7   :  { %v1161_v48 = vpack.c.bf16 %v1144_v39, %v1141_v36  ;;  %2006 = vmatprep.subr.bf16.mxu1 %v1162_v37  ;;  %2045 = vmatpush3.bf16.msra.mxu0 %v2137_v30 }
 0x5e8   :  { %2007 = vmatpush3.bf16.msra.mxu1 %v1162_v37 }
 0x5e9   :  { %2008 = vmatprep.subr.bf16.mxu1 %v1161_v48 }
 0x5ec   :  { %2009 = vmatpush3.bf16.msra.mxu1 %v1161_v48  ;;  %v2138_v48 = vld [vmem:[%s2734_s3 + $0x98] sm:$0xff]  }
 0x5ed   :  { %2010 = vmatprep.subr.bf16.mxu1 %v1160_v41  ;;  %2046 = vmatprep.subr.bf16.mxu0 %v2138_v48 }
 0x5ee   :  { %2047 = vmatpush3.bf16.msra.mxu0 %v2138_v48 }
 0x5f0   :  { %2011 = vmatpush3.bf16.msra.mxu1 %v1160_v41 }
 0x5f1   :  { %2012 = vmatprep.subr.bf16.mxu1 %v1159_v43 }
 0x5f4   :  { %2013 = vmatpush3.bf16.msra.mxu1 %v1159_v43  ;;  %v2139_v43 = vld [vmem:[%s2734_s3 + $0x90] sm:$0xff]  }
 0x5f5   :  { %2014 = vmatprep.subr.bf16.mxu1 %v1158_v45  ;;  %2048 = vmatprep.subr.bf16.mxu0 %v2139_v43 }
 0x5f6   :  { %2049 = vmatpush3.bf16.msra.mxu0 %v2139_v43 }
 0x5f7   :  { %2050 = vmatprep.subr.bf16.mxu0 %v2140_v0 }
 0x5f8   :  { %2015 = vmatpush3.bf16.msra.mxu1 %v1158_v45 }
 0x5f9   :  { %2016 = vmatprep.subr.bf16.mxu1 %v1157_v49 }
 0x5fa   :  { %2051 = vmatpush3.bf16.msra.mxu0 %v2140_v0 }
 0x5fc   :  { %2017 = vmatpush3.bf16.msra.mxu1 %v1157_v49  ;;  %v2141_v49 = vld [vmem:[%s2734_s3 + $0x80] sm:$0xff]  }
 0x5fd   :  { %2018 = vmatprep.subr.bf16.mxu1 %v1156_v51  ;;  %2052 = vmatprep.subr.bf16.mxu0 %v2141_v49 }
 0x5fe   :  { %2053 = vmatpush3.bf16.msra.mxu0 %v2141_v49 }
 0x600   :  { %2019 = vmatpush3.bf16.msra.mxu1 %v1156_v51 }
 0x601   :  { %2020 = vmatprep.subr.bf16.mxu1 %v1155_v54 }
 0x604   :  { %2021 = vmatpush3.bf16.msra.mxu1 %v1155_v54 }
 0x607   :  { %2023 = vmatmul.mubr.bf16.vlgmr.msra.gmra.mxu1 %v2242_v55 }
 0x608   :  { %2026 = vmatprep.mubr.bf16.mxu1 %v2364_v7 }
 0x60f   :  { %2027 = vmatmul.mubr.bf16.gmra.mxu1 %v2368_v8 }
 0x610   :  { %2030 = vmatprep.mubr.bf16.mxu1 %v2370_v9 }
 0x617   :  { %2031 = vmatmul.mubr.bf16.gmra.mxu1 %v2374_v10 }
 0x618   :  { %2034 = vmatprep.mubr.bf16.mxu1 %v2376_v11 }
 0x61f   :  { %2035 = vmatmul.mubr.bf16.gmra.mxu1 %v2380_v12 }
 0x6c7   :  { %v2024_v60 = vpop.f32.mrf.mxu1 }
 0x6c8   :  { %v2615_v8 = vmax.f32 %v2024_v60, 0.0 }
 0x6c9   :  { %v1197_v52 = vpop.f32.mrf.mxu1 }
 0x6ca   :  { %v2613_v61 = vmax.f32 %v1197_v52, 0.0  ;;  %v1278_v1 = vmul.f32 %v2615_v8, %v2615_v8 }
 0x6cb   :  { %v2025_v7 = vpop.f32.mrf.mxu1 }
 0x6cc   :  { %v1276_v9 = vmul.f32 %v2613_v61, %v2613_v61  ;;  %v2621_v57 = vmax.f32 %v2025_v7, 0.0 }
 0x6cd   :  { %v1200_v10 = vpop.f32.mrf.mxu1 }
 0x6ce   :  { %v2619_v11 = vmax.f32 %v1200_v10, 0.0  ;;  %1292 = vadd.xlane.f32.xlu0 %v1276_v9  ;;  %v1279_v2 = vmul.f32 %v2621_v57, %v2621_v57 }
 0x6cf   :  { %v2028_v12 = vpop.f32.mrf.mxu1 }
 0x6d0   :  { %v1277_v62 = vmul.f32 %v2619_v11, %v2619_v11  ;;  %v2629_v14 = vmax.f32 %v2028_v12, 0.0 }
 0x6d1   :  { %v1213_v63 = vpop.f32.mrf.mxu1 }
 0x6d2   :  { %v2627_v3 = vmax.f32 %v1213_v63, 0.0  ;;  %1296 = vadd.xlane.f32.xlu0 %v1278_v1  ;;  %1294 = vadd.xlane.f32.xlu1 %v1277_v62  ;;  %v1282_v15 = vmul.f32 %v2629_v14, %v2629_v14 }
 0x6d3   :  { %v2029_v59 = vpop.f32.mrf.mxu1 }
 0x6d4   :  { %v1280_v4 = vmul.f32 %v2627_v3, %v2627_v3  ;;  %v2640_v18 = vmax.f32 %v2029_v59, 0.0 }
 0x6d5   :  { %v1216_v24 = vpop.f32.mrf.mxu1 }
 0x6d6   :  { %v2635_v5 = vmax.f32 %v1216_v24, 0.0  ;;  %1298 = vadd.xlane.f32.xlu1 %v1279_v2  ;;  %1300 = vadd.xlane.f32.xlu0 %v1280_v4  ;;  %v1283_v23 = vmul.f32 %v2640_v18, %v2640_v18 }
 0x6d7   :  { %v2032_v21 = vpop.f32.mrf.mxu1 }
 0x6d8   :  { %v1281_v17 = vmul.f32 %v2635_v5, %v2635_v5  ;;  %v2651_v22 = vmax.f32 %v2032_v21, 0.0 }
 0x6d9   :  { %v1229_v16 = vpop.f32.mrf.mxu1 }
 0x6da   :  { %v2646_v20 = vmax.f32 %v1229_v16, 0.0  ;;  %1304 = vadd.xlane.f32.xlu0 %v1282_v15  ;;  %1302 = vadd.xlane.f32.xlu1 %v1281_v17  ;;  %v1286_v31 = vmul.f32 %v2651_v22, %v2651_v22 }
 0x6db   :  { %v2033_v19 = vpop.f32.mrf.mxu1 }
 0x6dc   :  { %v1284_v26 = vmul.f32 %v2646_v20, %v2646_v20  ;;  %v2662_v34 = vmax.f32 %v2033_v19, 0.0 }
 0x6dd   :  { %v1232_v28 = vpop.f32.mrf.mxu1 }
 0x6de   :  { %v2657_v35 = vmax.f32 %v1232_v28, 0.0  ;;  %1306 = vadd.xlane.f32.xlu1 %v1283_v23  ;;  %1308 = vadd.xlane.f32.xlu0 %v1284_v26  ;;  %v1287_v41 = vmul.f32 %v2662_v34, %v2662_v34 }
 0x6df   :  { %v2036_v29 = vpop.f32.mrf.mxu1 }
 0x6e0   :  { %v1285_v36 = vmul.f32 %v2657_v35, %v2657_v35  ;;  %v2673_v40 = vmax.f32 %v2036_v29, 0.0 }
 0x6e1   :  { %v1245_v37 = vpop.f32.mrf.mxu1 }
 0x6e2   :  { %v2668_v39 = vmax.f32 %v1245_v37, 0.0  ;;  %1312 = vadd.xlane.f32.xlu0 %v1286_v31  ;;  %1310 = vadd.xlane.f32.xlu1 %v1285_v36  ;;  %v1290_v45 = vmul.f32 %v2673_v40, %v2673_v40 }
 0x6e3   :  { %v2037_v38 = vpop.f32.mrf.mxu1 }
 0x6e4   :  { %v1288_v6 = vmul.f32 %v2668_v39, %v2668_v39  ;;  %v2684_v42 = vmax.f32 %v2037_v38, 0.0 }
 0x6e5   :  { %v1248_v33 = vpop.f32.mrf.mxu1 }
 0x6e6   :  { %v2679_v44 = vmax.f32 %v1248_v33, 0.0  ;;  %1314 = vadd.xlane.f32.xlu1 %v1287_v41  ;;  %1316 = vadd.xlane.f32.xlu0 %v1288_v6  ;;  %v1291_v50 = vmul.f32 %v2684_v42, %v2684_v42 }
 0x6e8   :  { %v1289_v47 = vmul.f32 %v2679_v44, %v2679_v44 }
 0x6ea   :  { %1320 = vadd.xlane.f32.xlu0 %v1290_v45  ;;  %1318 = vadd.xlane.f32.xlu1 %v1289_v47 }
 0x6ee   :  { %1322 = vadd.xlane.f32.xlu1 %v1291_v50 }
 0x757   :  { %v1293_v46 = vpop.xlane.xlu0 %1292 }
 0x758   :  { %v1324_v51 = vadd.f32 1e-12, %v1293_v46 }
 0x75a   :  { %2206 = vrsqrt.f32 %v1324_v51 }
 0x75b   :  { %v1297_v53 = vpop.xlane.xlu0 %1296  ;;  %v1295_v58 = vpop.xlane.xlu1 %1294 }
 0x75c   :  { %v1326_v54 = vadd.f32 1e-12, %v1297_v53  ;;  %v1325_v55 = vadd.f32 1e-12, %v1295_v58 }
 0x75e   :  { %2208 = vrsqrt.f32 %v1325_v55 }
 0x75f   :  { %v1299_v56 = vpop.xlane.xlu1 %1298  ;;  %v1301_v60 = vpop.xlane.xlu0 %1300  ;;  %2210 = vrsqrt.f32 %v1326_v54 }
 0x760   :  { %v1327_v52 = vadd.f32 1e-12, %v1299_v56  ;;  %v1328_v7 = vadd.f32 1e-12, %v1301_v60 }
 0x762   :  { %2212 = vrsqrt.f32 %v1327_v52 }
 0x763   :  { %v1305_v9 = vpop.xlane.xlu0 %1304  ;;  %v1303_v10 = vpop.xlane.xlu1 %1302  ;;  %2214 = vrsqrt.f32 %v1328_v7 }
 0x764   :  { %v1330_v12 = vadd.f32 1e-12, %v1305_v9  ;;  %v1329_v1 = vadd.f32 1e-12, %v1303_v10 }
 0x766   :  { %2216 = vrsqrt.f32 %v1329_v1 }
 0x767   :  { %v1307_v62 = vpop.xlane.xlu1 %1306  ;;  %v1309_v63 = vpop.xlane.xlu0 %1308  ;;  %2218 = vrsqrt.f32 %v1330_v12 }
 0x768   :  { %v1331_v59 = vadd.f32 1e-12, %v1307_v62  ;;  %v1332_v2 = vadd.f32 1e-12, %v1309_v63  ;;  %v2207_v4 = vpop.eup %2206  ;;  %v2247_v63 = vmov 0  }
 0x769   :  { %v1356_v19 = vmul.f32 %v2207_v4, %v2613_v61  ;;  %2109 = vset.pattern.permute.xlu0 %v2247_v63 }
 0x76a   :  { %2220 = vrsqrt.f32 %v1331_v59  ;;  %1613 = vperm.xlu0 %2109, %v2356_v27  }
 0x76b   :  { %v1313_v24 = vpop.xlane.xlu0 %1312  ;;  %v1311_v21 = vpop.xlane.xlu1 %1310  ;;  %2222 = vrsqrt.f32 %v1332_v2 }
 0x76c   :  { %v2209_v13 = vpop.eup %2208  ;;  %v1334_v15 = vadd.f32 1e-12, %v1313_v24  ;;  %v1333_v17 = vadd.f32 1e-12, %v1311_v21 }
 0x76d   :  { %v2211_v16 = vpop.eup %2210  ;;  %v1357_v32 = vmul.f32 %v2209_v13, %v2619_v11 }
 0x76e   :  { %2224 = vrsqrt.f32 %v1333_v17  ;;  %v1358_v31 = vmul.f32 %v2211_v16, %v2615_v8 }
 0x76f   :  { %v2213_v23 = vpop.eup %2212  ;;  %v1315_v26 = vpop.xlane.xlu1 %1314  ;;  %v1372_v29 = vpack.c.bf16 %v1357_v32, %v1356_v19  ;;  %2226 = vrsqrt.f32 %v1334_v15 }
 0x770   :  { %v1317_v28 = vpop.xlane.xlu0 %1316  ;;  %v1335_v30 = vadd.f32 1e-12, %v1315_v26  ;;  %v1359_v36 = vmul.f32 %v2213_v23, %v2621_v57  ;;  %v2215_v38 = vpop.eup %2214 }
 0x771   :  { %v1336_v37 = vadd.f32 1e-12, %v1317_v28  ;;  %2054 = vmatprep.mubr.bf16.mxu0 %v1372_v29  ;;  %v1360_v45 = vmul.f32 %v2215_v38, %v2627_v3 }
 0x772   :  { %2228 = vrsqrt.f32 %v1335_v30  ;;  %v1373_v48 = vpack.c.bf16 %v1359_v36, %v1358_v31 }
 0x773   :  { %v1319_v61 = vpop.xlane.xlu1 %1318  ;;  %v2217_v6 = vpop.eup %2216  ;;  %2230 = vrsqrt.f32 %v1336_v37 }
 0x774   :  { %v1321_v41 = vpop.xlane.xlu0 %1320  ;;  %v1337_v33 = vadd.f32 1e-12, %v1319_v61  ;;  %2055 = vmatmul.mubr.bf16.vlgmr.msra.gmra.mxu0 %v1373_v48  ;;  %v2219_v43 = vpop.eup %2218  ;;  %v1361_v47 = vmul.f32 %v2217_v6, %v2635_v5 }
 0x775   :  { %v1338_v11 = vadd.f32 1e-12, %v1321_v41  ;;  %v1362_v49 = vmul.f32 %v2219_v43, %v2629_v14 }
 0x776   :  { %2232 = vrsqrt.f32 %v1337_v33  ;;  %v1374_v0 = vpack.c.bf16 %v1361_v47, %v1360_v45 }
 0x777   :  { %v2221_v8 = vpop.eup %2220  ;;  %v1323_v57 = vpop.xlane.xlu1 %1322  ;;  %2234 = vrsqrt.f32 %v1338_v11 }
 0x778   :  { %v1339_v50 = vadd.f32 1e-12, %v1323_v57  ;;  %v1363_v46 = vmul.f32 %v2221_v8, %v2640_v18  ;;  %2058 = vmatprep.mubr.bf16.mxu0 %v1374_v0  ;;  %v2223_v51 = vpop.eup %2222 }
 0x779   :  { %v1364_v3 = vmul.f32 %v2223_v51, %v2646_v20 }
 0x77a   :  { %2236 = vrsqrt.f32 %v1339_v50  ;;  %v1375_v53 = vpack.c.bf16 %v1363_v46, %v1362_v49 }
 0x77b   :  { %v2225_v58 = vpop.eup %2224 }
 0x77c   :  { %2059 = vmatmul.mubr.bf16.gmra.mxu0 %v1375_v53  ;;  %v2227_v54 = vpop.eup %2226  ;;  %v1365_v5 = vmul.f32 %v2225_v58, %v2657_v35 }
 0x77d   :  { %v1366_v60 = vmul.f32 %v2227_v54, %v2651_v22 }
 0x77e   :  { %v1376_v56 = vpack.c.bf16 %v1365_v5, %v1364_v3 }
 0x77f   :  { %v2229_v55 = vpop.eup %2228 }
 0x780   :  { %v1367_v52 = vmul.f32 %v2229_v55, %v2662_v34  ;;  %2062 = vmatprep.mubr.bf16.mxu0 %v1376_v56  ;;  %v2231_v14 = vpop.eup %2230  ;;  %v2245_v34 = vmov 0.0  }
 0x781   :  { %v1368_v10 = vmul.f32 %v2231_v14, %v2668_v39  ;;  %2070 = vmatprep.subr.bf16.mxu1 %v2245_v34  ;;  %2086 = vmatprep.mubr.msk.bf16.mxu1 %vm2246_vm0, %v2245_v34  ;;  %v1399_v39 = vsub.s32 3, %v2350_v25 }
 0x782   :  { %v1377_v18 = vpack.c.bf16 %v1367_v52, %v1366_v60 }
 0x783   :  { %v2233_v7 = vpop.eup %2232 }
 0x784   :  { %2063 = vmatmul.mubr.bf16.gmra.mxu0 %v1377_v18  ;;  %v2235_v9 = vpop.eup %2234  ;;  %v1369_v12 = vmul.f32 %v2233_v7, %v2679_v44  ;;  %v1400_v44 = vrot.slane %v2356_v27, %v1399_v39 }
 0x785   :  { %v1370_v35 = vmul.f32 %v2235_v9, %v2673_v40 }
 0x786   :  { %v1378_v20 = vpack.c.bf16 %v1369_v12, %v1368_v10 }
 0x787   :  { %v2237_v1 = vpop.eup %2236 }
 0x788   :  { %v1371_v62 = vmul.f32 %v2237_v1, %v2684_v42  ;;  %2066 = vmatprep.mubr.bf16.mxu0 %v1378_v20 }
 0x78a   :  { %v1379_v22 = vpack.c.bf16 %v1371_v62, %v1370_v35  ;;  %v1562_v35 = vpack.c.bf16 %v2356_v27, %v2356_v27 }
 0x78c   :  { %2067 = vmatmul.mubr.bf16.gmra.mxu0 %v1379_v22 }
 0x7e5   :  { %v1614_v62 = vpop.permute.xlu0 %1613 }
 0x7e6   :  { %v1615_v22 = vrot.slane %v1614_v62, 1 }
 0x834   :  { %v2056_v40 = vpop.f32.mrf.mxu0 }
 0x835   :  { %v1492_v42 = vadd.f32 %v2056_v40, %v1400_v44 }
 0x836   :  { %v1483_v59 = vpop.f32.mrf.mxu0 }
 0x837   :  { %v1484_v4 = vadd.f32 %v1483_v59, %v1400_v44  ;;  %v1548_v13 = vmax.f32 %v1492_v42, 0.0 }
 0x838   :  { %v2057_v2 = vpop.f32.mrf.mxu0 }
 0x839   :  { %v1495_v24 = vadd.f32 %v2057_v2, %v1400_v44  ;;  %v1546_v19 = vmax.f32 %v1484_v4, 0.0 }
 0x83a   :  { %v1486_v21 = vpop.f32.mrf.mxu0 }
 0x83b   :  { %v1549_v15 = vmax.f32 %v1495_v24, 0.0  ;;  %v1487_v17 = vadd.f32 %v1486_v21, %v1400_v44 }
 0x83c   :  { %v2060_v16 = vpop.f32.mrf.mxu0 }
 0x83d   :  { %v1564_v32 = vpack.c.bf16 %v1549_v15, %v1548_v13  ;;  %v1547_v23 = vmax.f32 %v1487_v17, 0.0  ;;  %v1508_v52 = vadd.f32 %v2060_v16, %v1400_v44 }
 0x83e   :  { %v1499_v26 = vpop.f32.mrf.mxu0 }
 0x83f   :  { %v1563_v28 = vpack.c.bf16 %v1547_v23, %v1546_v19  ;;  %v1552_v18 = vmax.f32 %v1508_v52, 0.0  ;;  %v1500_v10 = vadd.f32 %v1499_v26, %v1400_v44 }
 0x840   :  { %v2061_v29 = vpop.f32.mrf.mxu0 }
 0x841   :  { %v1511_v56 = vadd.f32 %v2061_v29, %v1400_v44  ;;  %v1550_v1 = vmax.f32 %v1500_v10, 0.0 }
 0x842   :  { %v1502_v25 = vpop.f32.mrf.mxu0 }
 0x843   :  { %v1553_v14 = vmax.f32 %v1511_v56, 0.0  ;;  %v1503_v9 = vadd.f32 %v1502_v25, %v1400_v44 }
 0x844   :  { %v2064_v30 = vpop.f32.mrf.mxu0 }
 0x845   :  { %v1524_v46 = vadd.f32 %v2064_v30, %v1400_v44  ;;  %v1566_v7 = vpack.c.bf16 %v1553_v14, %v1552_v18  ;;  %v1551_v12 = vmax.f32 %v1503_v9, 0.0 }
 0x846   :  { %v1515_v31 = vpop.f32.mrf.mxu0 }
 0x847   :  { %v1556_v53 = vmax.f32 %v1524_v46, 0.0  ;;  %v1516_v3 = vadd.f32 %v1515_v31, %v1400_v44  ;;  %v1565_v20 = vpack.c.bf16 %v1551_v12, %v1550_v1 }
 0x848   :  { %v2065_v36 = vpop.f32.mrf.mxu0 }
 0x849   :  { %v1527_v50 = vadd.f32 %v2065_v36, %v1400_v44  ;;  %v1554_v55 = vmax.f32 %v1516_v3, 0.0 }
 0x84a   :  { %v1518_v37 = vpop.f32.mrf.mxu0 }
 0x84b   :  { %v1557_v51 = vmax.f32 %v1527_v50, 0.0  ;;  %v1519_v54 = vadd.f32 %v1518_v37, %v1400_v44 }
 0x84c   :  { %v2068_v38 = vpop.f32.mrf.mxu0 }
 0x84d   :  { %v1540_v41 = vadd.f32 %v2068_v38, %v1400_v44  ;;  %v1568_v58 = vpack.c.bf16 %v1557_v51, %v1556_v53  ;;  %v1555_v5 = vmax.f32 %v1519_v54, 0.0 }
 0x84e   :  { %v1531_v48 = vpop.f32.mrf.mxu0 }
 0x84f   :  { %v1560_v33 = vmax.f32 %v1540_v41, 0.0  ;;  %v1532_v8 = vadd.f32 %v1531_v48, %v1400_v44  ;;  %v1567_v60 = vpack.c.bf16 %v1555_v5, %v1554_v55 }
 0x850   :  { %v2069_v61 = vpop.f32.mrf.mxu0 }
 0x851   :  { %v1543_v6 = vadd.f32 %v2069_v61, %v1400_v44  ;;  %v1558_v0 = vmax.f32 %v1532_v8, 0.0 }
 0x852   :  { %v1534_v11 = vpop.f32.mrf.mxu0 }
 0x853   :  { %v1561_v43 = vmax.f32 %v1543_v6, 0.0  ;;  %v1535_v47 = vadd.f32 %v1534_v11, %v1400_v44 }
 0x855   :  { %v1570_v45 = vpack.c.bf16 %v1561_v43, %v1560_v33  ;;  %v1559_v57 = vmax.f32 %v1535_v47, 0.0 }
 0x857   :  { %2071 = vmatpush3.bf16.xpose.msra.mxu1 %v1570_v45  ;;  %v1569_v49 = vpack.c.bf16 %v1559_v57, %v1558_v0 }
 0x858   :  { %2072 = vmatprep.subr.bf16.mxu1 %v2245_v34 }
 0x85f   :  { %2073 = vmatpush3.bf16.xpose.msra.mxu1 %v1569_v49 }
 0x860   :  { %2074 = vmatprep.subr.bf16.mxu1 %v2245_v34 }
 0x867   :  { %2075 = vmatpush3.bf16.xpose.msra.mxu1 %v1568_v58 }
 0x868   :  { %2076 = vmatprep.subr.bf16.mxu1 %v2245_v34 }
 0x86f   :  { %2077 = vmatpush3.bf16.xpose.msra.mxu1 %v1567_v60 }
 0x870   :  { %2078 = vmatprep.subr.bf16.mxu1 %v2245_v34 }
 0x877   :  { %2079 = vmatpush3.bf16.xpose.msra.mxu1 %v1566_v7 }
 0x878   :  { %2080 = vmatprep.subr.bf16.mxu1 %v2245_v34 }
 0x87f   :  { %2081 = vmatpush3.bf16.xpose.msra.mxu1 %v1565_v20 }
 0x880   :  { %2082 = vmatprep.subr.bf16.mxu1 %v2245_v34 }
 0x887   :  { %2083 = vmatpush3.bf16.xpose.msra.mxu1 %v1564_v32 }
 0x888   :  { %2084 = vmatprep.subr.bf16.mxu1 %v2245_v34 }
 0x88f   :  { %2085 = vmatpush3.bf16.xpose.msra.mxu1 %v1563_v28 }
 0x896   :  { %2087 = vmatmul.mubr.bf16.vlgmr.msra.gmra.mxu1 %v1562_v35 }
 0x956   :  { %v1605_v63 = vpop.f32.mrf.mxu1 }
 0x957   :  { %v1617_v39 = vadd.f32 %v1615_v22, %v1605_v63 }
 0x958   :  { %v2088_v44 = vpop.f32.mrf.mxu1 }
 0x959   :  { %v1723_v40 = vmul.f32 -1.442695, %v1617_v39 }
 0x95a   :  { %v1608_v59 = vpop.f32.mrf.mxu1 }
 0x95b   :  { %2238 = vpow2.f32 %v1723_v40 }
 0x95c   :  { %v2089_v42 = vpop.f32.mrf.mxu1 }
 0x968   :  { %v2239_v2 = vpop.eup %2238 }
 0x969   :  { %v1621_v4 = vadd.f32 1.0, %v2239_v2 }
 0x96b   :  { %2240 = vrcp.f32 %v1621_v4 }
 0x978   :  { %v2241_v24 = vpop.eup %2240 }
 0x979   :  { %1624 = vst [vmem:[%s2736_s5 - $0x4] sm:$0x10] %v2241_v24 }
 0x97a   :  { %1629 = vsyncmov [#allocation3] }
 0x97d   :  { %s1630_s8 = vpop.sfrf %1629 }
 0x97e   :  { %p1724_p0 = scmp.ne.s32.totalorder %s1630_s8, 0 }
 0x980   :  { %1634 = shalt.err (%p1724_p0)  }

</bundles_post_ra>
